<compile_context>
chip_gen: v5e
topology: v5e:2x2
jax: 0.10.0
libtpu: 0.0.40
codegen_flags: <defaults>
</compile_context>

<pallas_src>
import functools

import jax
import jax.numpy as jnp
from jax.experimental import pallas as pl
from jax.experimental.pallas import tpu as pltpu


def _round_up(x, m):
    return ((x + m - 1) // m) * m


def _pick_row_tile(H, W, target_rows):
    """Largest divisor TH of H with TH*(W+2) <= target_rows (falls back to TH=1).

    Per-grid-step overhead is ~0.35us, so bigger flattened row tiles (512-1024) approach the HBM
    roofline. NOTE: if H has no divisor fitting target_rows this silently degrades to TH=1.
    """
    best = 1
    for th in range(1, H + 1):
        if H % th == 0 and th * (W + 2) <= target_rows:
            best = th
    return best


def _fused_forward(x, w_conv, b_conv, w_fc, b_fc, *, target_rows=512):
    N, C, H, W = x.shape
    F = w_conv.shape[0]
    NC = w_fc.shape[0]

    TH = _pick_row_tile(H, W, target_rows)
    num_hb = H // TH
    Wp = W + 2                               # padded width
    L = TH * Wp                              # flattened conv-output rows per tile (incl. 2 junk cols/row)
    max_off = 2 * Wp + 2                     # largest (kh, kw) flattened tap offset
    Lp = _round_up(L + max_off, 8)           # flattened padded-input rows per tile (halo + zero slack)
    K = 9 * C + 1                            # 9 taps x C channels + constant-1 bias column
    K_pad = _round_up(K, 128)
    F_pad = _round_up(F, 128)
    NC_pad = _round_up(NC, 128)

    assert H % TH == 0
    assert Lp >= (TH + 2) * Wp               # zero slack exists after the real halo'd block
    assert Lp >= L + max_off                 # every static tap slice stays inside the block
    # The last tap's slice reads (L + max_off) - (TH+2)*Wp == 2 rows from the zero slack; those rows
    # map only to junk columns (q % Wp >= W) which the pooling mask zeroes, so they never contribute.

    # ---------------- trace-time layout prep ----------------
    # TODO(synk): the overlapping halo'd row blocks are materialized in HBM here (~(TH+2)/TH extra
    # input copy + one transpose pass). Production path: keep the padded (N,(H+2)*(W+2),C) array and
    # read overlapping windows in-kernel via element-offset index_maps / manual make_async_copy.
    xp = jnp.pad(x, ((0, 0), (0, 0), (1, 1), (1, 1)))                  # (N, C, H+2, W+2)
    xt = jnp.transpose(xp, (0, 2, 3, 1))                               # (N, H+2, W+2, C)
    blocks = jnp.stack(
        [xt[:, hb * TH:hb * TH + TH + 2] for hb in range(num_hb)], axis=1
    )                                                                  # (N, num_hb, TH+2, W+2, C)
    x_blocks = blocks.reshape(N, num_hb, (TH + 2) * Wp, C)
    x_blocks = jnp.pad(x_blocks, ((0, 0), (0, 0), (0, Lp - (TH + 2) * Wp), (0, 0)))
    x_blocks = x_blocks.astype(jnp.bfloat16)                           # (N, num_hb, Lp, C)

    # conv weights -> one lane-dense (K_pad, F_pad) slab: row (kh*3+kw)*C + c = w_conv[:, c, kh, kw];
    # row 9*C carries the conv bias (paired with the in-kernel constant-1 column).
    # NOTE: bias lands in bf16 here; keep a separate f32 bias add if bit-closeness matters.
    w_taps = jnp.transpose(w_conv, (2, 3, 1, 0)).reshape(9 * C, F)
    w_cat = jnp.zeros((K_pad, F_pad), jnp.float32)
    w_cat = w_cat.at[:9 * C, :F].set(w_taps)
    w_cat = w_cat.at[9 * C, :F].set(b_conv)
    w_cat = w_cat.astype(jnp.bfloat16)       # bf16 operands, f32 MXU accumulation

    # masked global-average-pool as a lane-major (1, L) row: 1/(H*W) on real columns, 0 on the two
    # padded junk columns of each flattened row -> pooling is a single MXU matvec per grid step.
    qidx = jnp.arange(L)
    scale_row = jnp.where((qidx % Wp) < W, 1.0 / (H * W), 0.0)
    scale_row = scale_row.astype(jnp.float32).reshape(1, L)

    # classifier weights (tiny, kept f32)
    w_fc_p = jnp.pad(w_fc.T, ((0, F_pad - F), (0, NC_pad - NC))).astype(jnp.float32)
    b_fc_p = jnp.pad(b_fc, (0, NC_pad - NC)).reshape(1, NC_pad).astype(jnp.float32)

    offsets = tuple(kh * Wp + kw for kh in range(3) for kw in range(3))
    zero_tail = K_pad - 9 * C - 1

    def kernel(x_ref, w_ref, scale_ref, wfc_ref, bfc_ref, o_ref, pool_ref):
        h = pl.program_id(1)

        @pl.when(h == 0)
        def _():
            pool_ref[...] = jnp.zeros_like(pool_ref)
            o_ref[...] = jnp.zeros_like(o_ref)       # never flush uninitialized VMEM

        xb = x_ref[...]                              # (Lp, C) bf16
        # In-VMEM im2col: 9 shifted static slices of the tiny bf16 block (+ constant-1 bias column,
        # + zero lanes up to K_pad). Tens of KiB of shifts instead of 9 small K=C matmuls whose f32
        # results were re-sliced at unaligned sublane offsets and accumulated on the VPU.
        pieces = [xb[off:off + L] for off in offsets]
        pieces.append(jnp.ones((L, 1), jnp.bfloat16))
        if zero_tail > 0:
            pieces.append(jnp.zeros((L, zero_tail), jnp.bfloat16))
        xcat = jnp.concatenate(pieces, axis=1)       # (L, K_pad) bf16

        # conv (+ bias) for all 9 taps in ONE lane-dense MXU matmul, f32 accumulation
        acc = jnp.dot(xcat, w_ref[...], preferred_element_type=jnp.float32)   # (L, F_pad)
        y = jnp.maximum(acc, 0.0)                    # ReLU in f32 (v5e has no bf16 VPU)

        # masked partial global-average-pool on the MXU: (1, L) @ (L, F_pad)
        pool_ref[...] += jnp.dot(scale_ref[...], y, preferred_element_type=jnp.float32)

        @pl.when(h == pl.num_programs(1) - 1)
        def _():
            logits = jnp.dot(pool_ref[...], wfc_ref[...],
                             preferred_element_type=jnp.float32) + bfc_ref[...]
            o_ref[...] = jnp.broadcast_to(logits, (8, NC_pad))

    # VMEM budget from the actual tile footprint (x2 for double-buffered pipeline inputs/outputs),
    # clamped to <= 32 MiB so it also leaves headroom on v7x's 64 MiB VMEM.
    def _vmem(rows, cols, itemsize):
        return _round_up(max(rows, 1), 8) * _round_up(max(cols, 1), 128) * itemsize

    tile_bytes = (2 * _vmem(Lp, C, 2) + 2 * _vmem(K_pad, F_pad, 2) + 2 * _vmem(1, L, 4)
                  + 2 * _vmem(F_pad, NC_pad, 4) + 2 * _vmem(1, NC_pad, 4) + 2 * _vmem(8, NC_pad, 4)
                  + _vmem(1, F_pad, 4) + _vmem(L, K_pad, 2) + 2 * _vmem(L, F_pad, 4))
    vmem_limit = int(min(max(4 * tile_bytes, 16 * 2 ** 20), 32 * 2 ** 20))

    out = pl.pallas_call(
        kernel,
        out_shape=jax.ShapeDtypeStruct((N, 8, NC_pad), jnp.float32),
        grid_spec=pltpu.PrefetchScalarGridSpec(
            num_scalar_prefetch=0,
            grid=(N, num_hb),
            in_specs=[
                pl.BlockSpec((None, None, Lp, C), lambda n, h: (n, h, 0, 0)),    # halo'd row blocks
                pl.BlockSpec((K_pad, F_pad), lambda n, h: (0, 0)),               # conv weights+bias
                pl.BlockSpec((1, L), lambda n, h: (0, 0)),                       # pool mask/scale
                pl.BlockSpec((F_pad, NC_pad), lambda n, h: (0, 0)),              # fc weight
                pl.BlockSpec((1, NC_pad), lambda n, h: (0, 0)),                  # fc bias
            ],
            out_specs=pl.BlockSpec((None, 8, NC_pad), lambda n, h: (n, 0, 0)),
            scratch_shapes=[pltpu.VMEM((1, F_pad), jnp.float32)],                # GAP accumulator
        ),
        # Batch axis "parallel" (v7x megacore), row-block reduction axis "arbitrary".
        # TODO(synk): for v7x with N == 1, split the row-block axis (or F) across the 2 TensorCores
        # with per-core partial pools so the second core is not idle.
        compiler_params=pltpu.CompilerParams(
            dimension_semantics=("parallel", "arbitrary"),
            vmem_limit_bytes=vmem_limit,
        ),
    )(x_blocks, w_cat, scale_row, w_fc_p, b_fc_p)

    return out[:, 0, :NC]


@functools.partial(jax.jit, static_argnames=("target_rows",))
def model_forward(x, params, target_rows=512):
    return _fused_forward(x, params["w_conv"], params["b_conv"], params["w_fc"],
                          params["b_fc"], target_rows=target_rows)


def reference_forward(x, params):
    """Pure-JAX f32 reference matching PyTorch Conv2d(pad=1)+ReLU+GAP+Linear semantics."""
    y = jax.lax.conv_general_dilated(
        x, params["w_conv"], window_strides=(1, 1), padding=((1, 1), (1, 1)),
        dimension_numbers=("NCHW", "OIHW", "NCHW"))
    y = jax.nn.relu(y + params["b_conv"][None, :, None, None])
    pooled = y.mean(axis=(2, 3))
    return pooled @ params["w_fc"].T + params["b_fc"]


if __name__ == "__main__":
    N, C, H, W = 2, 4, 16, 16
    F = 32
    NUM_CLASSES = 10

    key = jax.random.PRNGKey(0)
    k0, k1, k2, k3, k4 = jax.random.split(key, 5)

    x = jax.random.normal(k0, (N, C, H, W), dtype=jnp.float32)
    params = {
        "w_conv": 0.1 * jax.random.normal(k1, (F, C, 3, 3), dtype=jnp.float32),
        "b_conv": 0.1 * jax.random.normal(k2, (F,), dtype=jnp.float32),
        "w_fc":   0.1 * jax.random.normal(k3, (NUM_CLASSES, F), dtype=jnp.float32),
        "b_fc":   0.1 * jax.random.normal(k4, (NUM_CLASSES,), dtype=jnp.float32),
    }

    ref = reference_forward(x, params)

    # big-tile path (single row block per image)
    logits = jax.block_until_ready(model_forward(x, params))
    assert logits.shape == (N, NUM_CLASSES)
    # bf16 conv operands/bias with f32 accumulation -> relaxed tolerance vs the f32 reference
    assert jnp.allclose(logits, ref, atol=2e-2, rtol=2e-2), "Pallas output mismatch (big tile)"

    # small-tile path: exercises the cross-grid-step pooled accumulation
    logits_small = jax.block_until_ready(model_forward(x, params, target_rows=160))
    assert jnp.allclose(logits_small, ref, atol=2e-2, rtol=2e-2), "Pallas output mismatch (tiled)"

    print("KERNEL_OK")
</pallas_src>

<mosaic_0001>
module attributes {stable_mosaic.version = 11 : i64} {
  func.func @kernel(%arg0: i32, %arg1: i32, %arg2: memref<1x1x328x4xbf16, #tpu.memory_space<vmem>>, %arg3: memref<128x128xbf16, #tpu.memory_space<vmem>>, %arg4: memref<1x288xf32, #tpu.memory_space<vmem>>, %arg5: memref<128x128xf32, #tpu.memory_space<vmem>>, %arg6: memref<1x128xf32, #tpu.memory_space<vmem>>, %arg7: memref<1x8x128xf32, #tpu.memory_space<vmem>>, %arg8: memref<1x128xf32, #tpu.memory_space<vmem>>) attributes {dimension_semantics = [#tpu.dimension_semantics<parallel>, #tpu.dimension_semantics<arbitrary>], iteration_bounds = array<i64: 2, 1>, scalar_prefetch = 0 : i64, scratch_operands = 1 : i64, tpu.core_type = #tpu.core_type<tc>, window_params = [{transform_indices = @transform_0, window_bounds = array<i64: 1, 1, 328, 4>}, {pipeline_mode = #tpu.pipeline_mode<synchronous>, transform_indices = @transform_1, window_bounds = array<i64: 128, 128>}, {pipeline_mode = #tpu.pipeline_mode<synchronous>, transform_indices = @transform_2, window_bounds = array<i64: 1, 288>}, {pipeline_mode = #tpu.pipeline_mode<synchronous>, transform_indices = @transform_3, window_bounds = array<i64: 128, 128>}, {pipeline_mode = #tpu.pipeline_mode<synchronous>, transform_indices = @transform_4, window_bounds = array<i64: 1, 128>}, {transform_indices = @transform_5, window_bounds = array<i64: 1, 8, 128>}]} {
    %c0_i32 = arith.constant 0 : i32
    %0 = arith.cmpi eq, %arg1, %c0_i32 : i32
    %1 = arith.extui %0 : i1 to i32
    %c0_i32_0 = arith.constant 0 : i32
    %2 = arith.cmpi ne, %1, %c0_i32_0 : i32
    scf.if %2 {
      %cst_18 = arith.constant 0.000000e+00 : f32
      %29 = vector.broadcast %cst_18 : f32 to vector<1x128xf32>
      %c0_19 = arith.constant 0 : index
      %c0_20 = arith.constant 0 : index
      %30 = vector.load %arg8[%c0_19, %c0_20] : memref<1x128xf32, #tpu.memory_space<vmem>>, vector<1x128xf32>
      tpu.vector_store %arg8[%c0_19, %c0_20], %29 {strides = array<i32>} : memref<1x128xf32, #tpu.memory_space<vmem>>, vector<1x128xf32>,
      %cst_21 = arith.constant 0.000000e+00 : f32
      %31 = vector.broadcast %cst_21 : f32 to vector<8x128xf32>
      %c0_22 = arith.constant 0 : index
      %c0_23 = arith.constant 0 : index
      %c0_24 = arith.constant 0 : index
      %32 = vector.load %arg7[%c0_22, %c0_23, %c0_24] : memref<1x8x128xf32, #tpu.memory_space<vmem>>, vector<1x8x128xf32>
      %33 = vector.shape_cast %32 : vector<1x8x128xf32> to vector<8x128xf32>
      %34 = vector.shape_cast %31 : vector<8x128xf32> to vector<1x8x128xf32>
      tpu.vector_store %arg7[%c0_22, %c0_23, %c0_24], %34 {strides = array<i32>} : memref<1x8x128xf32, #tpu.memory_space<vmem>>, vector<1x8x128xf32>,
    } else {
    }
    %c0 = arith.constant 0 : index
    %c0_1 = arith.constant 0 : index
    %c0_2 = arith.constant 0 : index
    %c0_3 = arith.constant 0 : index
    %3 = vector.load %arg2[%c0, %c0_1, %c0_2, %c0_3] : memref<1x1x328x4xbf16, #tpu.memory_space<vmem>>, vector<1x1x328x4xbf16>
    %4 = vector.shape_cast %3 : vector<1x1x328x4xbf16> to vector<328x4xbf16>
    %5 = vector.extract_strided_slice %4 {offsets = [0, 0], sizes = [288, 4], strides = [1, 1]} : vector<328x4xbf16> to vector<288x4xbf16>
    %6 = vector.extract_strided_slice %4 {offsets = [1, 0], sizes = [288, 4], strides = [1, 1]} : vector<328x4xbf16> to vector<288x4xbf16>
    %7 = vector.extract_strided_slice %4 {offsets = [2, 0], sizes = [288, 4], strides = [1, 1]} : vector<328x4xbf16> to vector<288x4xbf16>
    %8 = vector.extract_strided_slice %4 {offsets = [18, 0], sizes = [288, 4], strides = [1, 1]} : vector<328x4xbf16> to vector<288x4xbf16>
    %9 = vector.extract_strided_slice %4 {offsets = [19, 0], sizes = [288, 4], strides = [1, 1]} : vector<328x4xbf16> to vector<288x4xbf16>
    %10 = vector.extract_strided_slice %4 {offsets = [20, 0], sizes = [288, 4], strides = [1, 1]} : vector<328x4xbf16> to vector<288x4xbf16>
    %11 = vector.extract_strided_slice %4 {offsets = [36, 0], sizes = [288, 4], strides = [1, 1]} : vector<328x4xbf16> to vector<288x4xbf16>
    %12 = vector.extract_strided_slice %4 {offsets = [37, 0], sizes = [288, 4], strides = [1, 1]} : vector<328x4xbf16> to vector<288x4xbf16>
    %13 = vector.extract_strided_slice %4 {offsets = [38, 0], sizes = [288, 4], strides = [1, 1]} : vector<328x4xbf16> to vector<288x4xbf16>
    %cst = arith.constant 1.000000e+00 : bf16
    %14 = vector.broadcast %cst : bf16 to vector<288x1xbf16>
    %cst_4 = arith.constant 0.000000e+00 : bf16
    %15 = vector.broadcast %cst_4 : bf16 to vector<288x91xbf16>
    %16 = tpu.concatenate %5, %6, %7, %8, %9, %10, %11, %12, %13, %14, %15 in 1 : vector<288x4xbf16>, vector<288x4xbf16>, vector<288x4xbf16>, vector<288x4xbf16>, vector<288x4xbf16>, vector<288x4xbf16>, vector<288x4xbf16>, vector<288x4xbf16>, vector<288x4xbf16>, vector<288x1xbf16>, vector<288x91xbf16> -> vector<288x128xbf16>
    %c0_5 = arith.constant 0 : index
    %c0_6 = arith.constant 0 : index
    %17 = vector.load %arg3[%c0_5, %c0_6] : memref<128x128xbf16, #tpu.memory_space<vmem>>, vector<128x128xbf16>
    %cst_7 = arith.constant dense<0.000000e+00> : vector<288x128xf32>
    %18 = tpu.matmul %16, %17, %cst_7 {dimension_numbers = #tpu.dot_dimension_numbers<[1], [0], [0], [1], [0, 0, 1, 1], [], []>} : vector<288x128xbf16>, vector<128x128xbf16>, vector<288x128xf32> -> vector<288x128xf32>
    %cst_8 = arith.constant 0.000000e+00 : f32
    %19 = vector.broadcast %cst_8 : f32 to vector<288x128xf32>
    %20 = arith.maximumf %18, %19 : vector<288x128xf32>
    %c0_9 = arith.constant 0 : index
    %c0_10 = arith.constant 0 : index
    %21 = vector.load %arg8[%c0_9, %c0_10] : memref<1x128xf32, #tpu.memory_space<vmem>>, vector<1x128xf32>
    %c0_11 = arith.constant 0 : index
    %c0_12 = arith.constant 0 : index
    %22 = vector.load %arg4[%c0_11, %c0_12] : memref<1x288xf32, #tpu.memory_space<vmem>>, vector<1x288xf32>
    %cst_13 = arith.constant dense<0.000000e+00> : vector<1x128xf32>
    %23 = tpu.matmul %22, %20, %cst_13 {dimension_numbers = #tpu.dot_dimension_numbers<[1], [0], [0], [1], [0, 0, 1, 1], [], []>} : vector<1x288xf32>, vector<288x128xf32>, vector<1x128xf32> -> vector<1x128xf32>
    %24 = arith.addf %21, %23 : vector<1x128xf32>
    %c0_14 = arith.constant 0 : index
    %c0_15 = arith.constant 0 : index
    %25 = vector.load %arg8[%c0_14, %c0_15] : memref<1x128xf32, #tpu.memory_space<vmem>>, vector<1x128xf32>
    tpu.vector_store %arg8[%c0_14, %c0_15], %24 {strides = array<i32>} : memref<1x128xf32, #tpu.memory_space<vmem>>, vector<1x128xf32>,
    %c0_i32_16 = arith.constant 0 : i32
    %26 = arith.cmpi eq, %arg1, %c0_i32_16 : i32
    %27 = arith.extui %26 : i1 to i32
    %c0_i32_17 = arith.constant 0 : i32
    %28 = arith.cmpi ne, %27, %c0_i32_17 : i32
    scf.if %28 {
      %c0_18 = arith.constant 0 : index
      %c0_19 = arith.constant 0 : index
      %29 = vector.load %arg8[%c0_18, %c0_19] : memref<1x128xf32, #tpu.memory_space<vmem>>, vector<1x128xf32>
      %c0_20 = arith.constant 0 : index
      %c0_21 = arith.constant 0 : index
      %30 = vector.load %arg5[%c0_20, %c0_21] : memref<128x128xf32, #tpu.memory_space<vmem>>, vector<128x128xf32>
      %cst_22 = arith.constant dense<0.000000e+00> : vector<1x128xf32>
      %31 = tpu.matmul %29, %30, %cst_22 {dimension_numbers = #tpu.dot_dimension_numbers<[1], [0], [0], [1], [0, 0, 1, 1], [], []>} : vector<1x128xf32>, vector<128x128xf32>, vector<1x128xf32> -> vector<1x128xf32>
      %c0_23 = arith.constant 0 : index
      %c0_24 = arith.constant 0 : index
      %32 = vector.load %arg6[%c0_23, %c0_24] : memref<1x128xf32, #tpu.memory_space<vmem>>, vector<1x128xf32>
      %33 = arith.addf %31, %32 : vector<1x128xf32>
      %34 = vector.shape_cast %33 : vector<1x128xf32> to vector<1x128xf32>
      %35 = vector.broadcast %34 : vector<1x128xf32> to vector<8x128xf32>
      %c0_25 = arith.constant 0 : index
      %c0_26 = arith.constant 0 : index
      %c0_27 = arith.constant 0 : index
      %36 = vector.load %arg7[%c0_25, %c0_26, %c0_27] : memref<1x8x128xf32, #tpu.memory_space<vmem>>, vector<1x8x128xf32>
      %37 = vector.shape_cast %36 : vector<1x8x128xf32> to vector<8x128xf32>
      %38 = vector.shape_cast %35 : vector<8x128xf32> to vector<1x8x128xf32>
      tpu.vector_store %arg7[%c0_25, %c0_26, %c0_27], %38 {strides = array<i32>} : memref<1x8x128xf32, #tpu.memory_space<vmem>>, vector<1x8x128xf32>,
    } else {
    }
    return
  }
  func.func @transform_0(%arg0: i32, %arg1: i32) -> (i32, i32, i32, i32) {
    %c0_i32 = arith.constant 0 : i32
    %c0_i32_0 = arith.constant 0 : i32
    %c0_i32_1 = arith.constant 0 : i32
    return %arg0, %arg1, %c0_i32, %c0_i32_0 : i32, i32, i32, i32
  }
  func.func @transform_1(%arg0: i32, %arg1: i32) -> (i32, i32) {
    %c0_i32 = arith.constant 0 : i32
    %c0_i32_0 = arith.constant 0 : i32
    %c0_i32_1 = arith.constant 0 : i32
    return %c0_i32, %c0_i32_0 : i32, i32
  }
  func.func @transform_2(%arg0: i32, %arg1: i32) -> (i32, i32) {
    %c0_i32 = arith.constant 0 : i32
    %c0_i32_0 = arith.constant 0 : i32
    %c0_i32_1 = arith.constant 0 : i32
    return %c0_i32, %c0_i32_0 : i32, i32
  }
  func.func @transform_3(%arg0: i32, %arg1: i32) -> (i32, i32) {
    %c0_i32 = arith.constant 0 : i32
    %c0_i32_0 = arith.constant 0 : i32
    %c0_i32_1 = arith.constant 0 : i32
    return %c0_i32, %c0_i32_0 : i32, i32
  }
  func.func @transform_4(%arg0: i32, %arg1: i32) -> (i32, i32) {
    %c0_i32 = arith.constant 0 : i32
    %c0_i32_0 = arith.constant 0 : i32
    %c0_i32_1 = arith.constant 0 : i32
    return %c0_i32, %c0_i32_0 : i32, i32
  }
  func.func @transform_5(%arg0: i32, %arg1: i32) -> (i32, i32, i32) {
    %c0_i32 = arith.constant 0 : i32
    %c0_i32_0 = arith.constant 0 : i32
    %c0_i32_1 = arith.constant 0 : i32
    return %arg0, %c0_i32, %c0_i32_0 : i32, i32, i32
  }
}

</mosaic_0001>

<bundles_post_ra>
// kernel: model_forward.1
= control target key start
LH: loop header
LB: loop body
LE: loop exit
PB: predicated region body
PF: predicated region fallthrough
CT: control target
= control target key end

     0   :  { %s2173_s18 = smov 0   ;;  %s2175_s19 = smov 0   ;;  %s3708_s0 = inlined_call_operand.vmem [shape: bf16[2,1,328,4], index: 0, kind: input, shape index: {}]   ;;  %s3709_s1 = inlined_call_operand.vmem [shape: bf16[128,128], index: 1, kind: input, shape index: {}]   ;;  %s3710_s2 = inlined_call_operand.vmem [shape: f32[1,288], index: 2, kind: input, shape index: {}]   ;;  %s3711_s3 = inlined_call_operand.vmem [shape: f32[128,128], index: 3, kind: input, shape index: {}]   ;;  %s3712_s4 = inlined_call_operand.vmem [shape: f32[1,128], index: 4, kind: input, shape index: {}]   ;;  %s3713_s5 = inlined_call_operand.vmem [shape: f32[2,8,128], index: 5, kind: output, shape index: {}]  }
   0x1   :  { %s2177_s20 = smov 0  }
   0x2 LB: > { %s27_s21 = sadd.s32 1, %s2128_s19  ;;  %p1876_p0 = scmp.ge.s32.totalorder %s2132_s20, 1  ;;  %s2132_s20 = sphi %s2177_s20, %s15_s20   ;;  %s2128_s19 = sphi %s2175_s19, %s3878_s19   ;;  %s2124_s18 = sphi %s2173_s18, %s3877_s18  }
   0x3   : > { %p29_p1 = scmp.ge.s32.totalorder %s27_s21, 2  ;;  %p205_p2 = scmp.lt.s32.totalorder %s2132_s20, 3 }
   0x5   : > { %s3880_s21 = smov (%p29_p1, %s27_s21), 0  ;;  %p206_p3 = pnand %p1876_p0, %p205_p2 }
   0x7   : > { %209 = sbr.rel (%p206_p3) target bundleno = 944 (0x3b0), region = 40 }
   0xc   : > { %p236_p4 = scmp.lt.s32.totalorder %s2124_s18, 1  ;;  %vm576_vm0 = vcmask 1046528   ;;  %vm818_vm1 = vcmask 1045504   ;;  %s2134_s26 = smov 12   ;;  %vm1060_vm2 = vcmask 1044480   ;;  %vm1134_vm6 = vcmask 31744  }
   0xd   : > { %s2135_s27 = smov 8   ;;  %vm391_vm3 = vsmask.f32 7424  ;;  %s2136_s28 = smov 20   ;;  %vm696_vm4 = vsmask.f32 6400 }
   0xe   : > { %s3882_s18 = smov (!%p236_p4, %s2124_s18), 1  ;;  %s2137_s29 = smov 32   ;;  %vm938_vm5 = vsmask.f32 5376  ;;  %vm1171_vm7 = vcmask 64512   ;;  %vm1208_vm8 = vcmask 97280  }
   0xf   : > { %s2064_s22 = smul.u32 164, %s3882_s18  ;;  %s2138_s30 = smov 4   ;;  %vm1245_vm9 = vcmask 130048   ;;  %vm1282_vm10 = vcmask 162816   ;;  %vm1319_vm11 = vcmask 195584   ;;  %vm1356_vm12 = vcmask 228352  }
  0x10   : > { %s2139_s6 = smov 24   ;;  %s2140_s7 = smov 16   ;;  %vm1393_vm13 = vcmask 261120   ;;  %vm1430_vm14 = vcmask 293888   ;;  %vm1450_vm15 = vcmask 302080  }
  0x11   : > { %s2197_s25 = scalar_lea.vmem %s3708_s0, %s2064_s22  ;;  %s2141_s8 = smov 28  }
  0x12   : > { %v2200_v0 = vld [vmem:[%s2197_s25 + $0x58] sm:$0xff]  ;;  %v2203_v1 = vld [vmem:[%s2197_s25 + $0x60] sm:$0xff]  ;;  %v2206_v2 = vld [vmem:[%s2197_s25 + $0x50] sm:$0xff]  ;;  %s1878_s23 = sshll.u32 %s3882_s18, 3 }
  0x13   : > { %3781 = vst [vmem:[#allocation3_spill] sm:$0xff] %v2200_v0  ;;  %v2209_v3 = vld [vmem:[%s2197_s25 + $0x68] sm:$0xff]  ;;  %v598_v4 = vrot.slane %v2200_v0, 1  ;;  %v600_v5 = vrot.slane %v2203_v1, 1  ;;  %v3718_v6 = vrot.slane %v2206_v2, 1  ;;  %v3717_v7 = vrot.slane %v2200_v0, 2  ;;  %s248_s10 = scalar_lea.vmem %s3713_s5, %s1878_s23 }
  0x14   : > { %3782 = vst [vmem:[#allocation4_spill] sm:$0xff] %v2203_v1  ;;  %v840_v8 = vrot.slane %v2203_v1, 2  ;;  %v3714_v9 = vrot.slane %v2203_v1, 3  ;;  %v1082_v10 = vrot.slane %v2209_v3, 3  ;;  %v2219_v11 = vshll.u32 %v2206_v2, 16  ;;  %v2300_v45 = vld [vmem:[%s2197_s25] sm:$0xff] }
  0x15   : > { %3783 = vst [vmem:[#allocation5_spill] sm:$0xff] %v2206_v2  ;;  %v2224_v12 = vsel %vm576_vm0, %v598_v4, %v600_v5  ;;  %v2229_v13 = vsel %vm576_vm0, %v3718_v6, %v598_v4  ;;  %v2232_v14 = vshrl.u32 %v2206_v2, 16  ;;  %v2235_v15 = vshll.u32 %v2200_v0, 16  ;;  %v2312_v50 = vld [vmem:[%s2197_s25 + $0x8] sm:$0xff]  ;;  %v2329_v58 = vld [vmem:[%s2197_s25 + $0x70] sm:$0xff]  ;;  %v2496_v6 = vld [vmem:[%s2197_s25 + $0x40] sm:$0xff] }
  0x16   : > { %3784 = vst [vmem:[#allocation6_spill] sm:$0xff] %v2229_v13  ;;  %680 = vrot.lane.b32.xlu1 %v2224_v12, %s2134_s26  ;;  %634 = vrot.lane.b32.xlu0 %v2229_v13, %s2135_s27  ;;  %v2244_v16 = vsel %vm818_vm1, %v3717_v7, %v840_v8  ;;  %v3715_v17 = vrot.slane %v2219_v11, 1  ;;  %v2251_v19 = vshrl.u32 %v2200_v0, 16  ;;  %v2254_v20 = vshll.u32 %v2203_v1, 16 }
  0x17   : > { %3785 = vst [vmem:[#allocation7_spill] sm:$0xff] %v2235_v15  ;;  %876 = vrot.lane.b32.xlu2 %v2244_v16, %s2136_s28  ;;  %v482_v18 = vrot.slane %v2235_v15, 1  ;;  %v2257_v21 = vshrl.u32 %v2203_v1, 16  ;;  %v842_v23 = vrot.slane %v2209_v3, 2  ;;  %v2264_v24 = vshll.u32 %v2209_v3, 16 }
  0x18   : > { %3786 = vst [vmem:[#allocation8_spill] sm:$0xff] %v2244_v16  ;;  %v478_v22 = vor.u32 %v2232_v14, %v3715_v17  ;;  %v1083_v25 = vsel %vm1060_vm2, %v3714_v9, %v1082_v10  ;;  %v737_v26 = vrot.slane %v2235_v15, 2  ;;  %v2273_v27 = vshrl.u32 %v2209_v3, 16  ;;  %v2728_v15 = vld [vmem:[%s2197_s25 + $0x48] sm:$0xff] }
  0x19   : > { %3787 = vst [vmem:[#allocation9_spill] sm:$0xff] %v2251_v19  ;;  %v736_v29 = vrot.slane %v2251_v19, 1  ;;  %v740_v30 = vrot.slane %v2257_v21, 1  ;;  %v741_v31 = vrot.slane %v2254_v20, 2  ;;  %v978_v32 = vrot.slane %v2257_v21, 2 }
  0x1a   : > { %v483_v28 = vsel %vm391_vm3, %v478_v22, %v482_v18  ;;  %v979_v33 = vrot.slane %v2254_v20, 3  ;;  %v982_v34 = vrot.slane %v2273_v27, 2  ;;  %v983_v35 = vrot.slane %v2264_v24, 3 }
  0x1b   : > { %v843_v36 = vsel %vm818_vm1, %v840_v8, %v842_v23  ;;  %v2289_v37 = vor.u32 %v737_v26, %v736_v29  ;;  %v742_v38 = vor.u32 %v741_v31, %v740_v30  ;;  %v486_v41 = vor.u32 %v2251_v19, %v482_v18 }
  0x1c   : > { %v2291_v39 = vor.u32 %v979_v33, %v978_v32  ;;  %v984_v40 = vor.u32 %v983_v35, %v982_v34  ;;  %v490_v42 = vrot.slane %v2254_v20, 1  ;;  %v744_v47 = vrot.slane %v2273_v27, 1  ;;  %v2381_v34 = vld [vmem:[%s2197_s25 + $0x28] sm:$0xff] }
  0x1d   : > { %3788 = vst [vmem:[#allocation10_spill] sm:$0xff] %v2289_v37  ;;  %v743_v43 = vsel %vm696_vm4, %v2289_v37, %v742_v38  ;;  %v745_v48 = vrot.slane %v2264_v24, 2  ;;  %v3731_v49 = vrot.slane %v2209_v3, 1  ;;  %v395_v51 = vshll.u32 %v2300_v45, 16 }
  0x1e   : > { %1118 = vrot.lane.b32.xlu1 %v1083_v25, %s2137_s29  ;;  %560 = vrot.lane.b32.xlu0 %v483_v28, %s2138_s30  ;;  %3789 = vst [vmem:[#allocation11_spill] sm:$0xff] %v2291_v39  ;;  %v985_v44 = vsel %vm938_vm5, %v2291_v39, %v984_v40  ;;  %v491_v46 = vsel %vm391_vm3, %v486_v41, %v490_v42  ;;  %v393_v54 = vshrl.u32 %v2300_v45, 16  ;;  %v400_v56 = vshll.u32 %v2312_v50, 16  ;;  %v2656_v39 = vld [vmem:[%s2197_s25 + $0x20] sm:$0xff] }
  0x1f   : > { %922 = vrot.lane.b32.xlu2 %v843_v36, %s2139_s6  ;;  %v2315_v52 = vor.u32 %v745_v48, %v744_v47  ;;  %v2322_v53 = vsel %vm576_vm0, %v600_v5, %v3731_v49  ;;  %v397_v55 = vrot.slane %v395_v51, 1  ;;  %v577_v61 = vrot.slane %v2300_v45, 1  ;;  %v2347_v5 = vld [vmem:[%s2197_s25 + $0x10] sm:$0xff] }
  0x20   : > { %v2336_v60 = vrot.slane %v400_v56, 1  ;;  %v578_v62 = vrot.slane %v2312_v50, 1  ;;  %v2341_v63 = vshll.u32 %v2329_v58, 16  ;;  %v2344_v4 = vshrl.u32 %v2329_v58, 16 }
  0x21   : > { %v747_v57 = vsel %vm696_vm4, %v742_v38, %v2315_v52  ;;  %v398_v59 = vor.u32 %v397_v55, %v393_v54  ;;  %v3728_v25 = vrot.slane %v2347_v5, 1  ;;  %v3726_v26 = vrot.slane %v2329_v58, 2  ;;  %v2406_v54 = vld [vmem:[%s2197_s25 + $0x30] sm:$0xff] }
  0x22   : > { %v986_v18 = vrot.slane %v2344_v4, 2  ;;  %v987_v22 = vrot.slane %v2341_v63, 3  ;;  %v3729_v28 = vshrl.u32 %v2312_v50, 16  ;;  %v2361_v29 = vshll.u32 %v2347_v5, 16 }
  0x23   : > { %v403_v8 = vsel %vm391_vm3, %v398_v59, %v2336_v60  ;;  %v2364_v30 = vshrl.u32 %v2347_v5, 16  ;;  %v2371_v32 = vsel %vm576_vm0, %v578_v62, %v3728_v25  ;;  %v2378_v33 = vsel %vm818_vm1, %v842_v23, %v3726_v26 }
  0x24   : > { %v2366_v31 = vor.u32 %v987_v22, %v986_v18  ;;  %v697_v35 = vrot.slane %v3729_v28, 1  ;;  %v701_v41 = vrot.slane %v2361_v29, 2  ;;  %v3725_v23 = vrot.slane %v2329_v58, 3 }
  0x25   : > { %v700_v38 = vrot.slane %v2364_v30, 1  ;;  %v820_v47 = vrot.slane %v2347_v5, 2  ;;  %v2400_v48 = vshll.u32 %v2381_v34, 16  ;;  %v494_v18 = vor.u32 %v2257_v21, %v490_v42 }
  0x26   : > { %802 = vrot.lane.b32.xlu1 %v743_v43, %s2140_s7  ;;  %1044 = vrot.lane.b32.xlu0 %v985_v44, %s2141_s8  ;;  %v989_v43 = vsel %vm938_vm5, %v984_v40, %v2366_v31  ;;  %v2390_v44 = vld [vmem:[%s2197_s25 + $0x18] sm:$0xff]  ;;  %v939_v22 = vrot.slane %v2364_v30, 2  ;;  %v749_v49 = vrot.slane %v2341_v63, 2 }
  0x27   : > { %562 = vrot.lane.b32.xlu2 %v491_v46, %s2138_s30  ;;  %v819_v46 = vrot.slane %v2312_v50, 2  ;;  %v2403_v51 = vor.u32 %v701_v41, %v700_v38  ;;  %v2409_v55 = vshll.u32 %v2390_v44, 16  ;;  %v3720_v42 = vrot.slane %v2390_v44, 2 }
  0x29   : > { %v821_v59 = vsel %vm818_vm1, %v819_v46, %v820_v47  ;;  %v943_v38 = vrot.slane %v2409_v55, 3  ;;  %v705_v16 = vrot.slane %v2409_v55, 2 }
  0x2e   : > { %682 = vrot.lane.b32.xlu1 %v2322_v53, %s2134_s26  ;;  %636 = vrot.lane.b32.xlu0 %v2224_v12, %s2135_s27  ;;  %v579_v12 = vsel %vm576_vm0, %v577_v61, %v578_v62  ;;  %v3716_v61 = vrot.slane %v2400_v48, 1  ;;  %v2422_v62 = vshrl.u32 %v2381_v34, 16 }
  0x2f   : > { %804 = vrot.lane.b32.xlu2 %v747_v57, %s2140_s7  ;;  %v1085_v57 = vsel %vm1060_vm2, %v1082_v10, %v3725_v23  ;;  %v3719_v10 = vrot.slane %v2264_v24, 1 }
  0x30   : > { %v438_v20 = vor.u32 %v2422_v62, %v3716_v61 }
  0x31   : > { %v2440_v41 = vsel %vm391_vm3, %v494_v18, %v3719_v10  ;;  %v2469_v18 = vshrl.u32 %v2406_v54, 16 }
  0x33   : > { %3792 = vst [vmem:[#allocation14_spill] sm:$0xff] %v2469_v18 }
  0x36   : > { %878 = vrot.lane.b32.xlu1 %v843_v36, %s2136_s28  ;;  %540 = vrot.lane.b32.xlu0 %v403_v8, %s2138_s30  ;;  %v698_v36 = vrot.slane %v400_v56, 2  ;;  %v2412_v56 = vshrl.u32 %v2390_v44, 16 }
  0x37   : > { %614 = vrot.lane.b32.xlu2 %v579_v12, %s2135_s27  ;;  %v2427_v12 = vshll.u32 %v2406_v54, 16 }
  0x38   : > { %v699_v40 = vor.u32 %v698_v36, %v697_v35  ;;  %v940_v35 = vrot.slane %v2361_v29, 3  ;;  %v942_v36 = vrot.slane %v2412_v56, 2 }
  0x39   : > { %3790 = vst [vmem:[#allocation12_spill] sm:$0xff] %v2427_v12  ;;  %v3723_v21 = vrot.slane %v2427_v12, 1  ;;  %v717_v9 = vrot.slane %v2427_v12, 2  ;;  %v3804_v37 = vrot.slane %v2427_v12, 1 }
  0x3a   : > { %v703_v8 = vsel %vm696_vm4, %v699_v40, %v2403_v51  ;;  %v2450_v46 = vor.u32 %v943_v38, %v942_v36  ;;  %v2453_v40 = vld [vmem:[%s2197_s25 + $0x38] sm:$0xff]  ;;  %v3721_v36 = vrot.slane %v2390_v44, 3  ;;  %v3722_v38 = vrot.slane %v2381_v34, 1 }
  0x3b   : > { %3791 = vst [vmem:[#allocation13_spill] sm:$0xff] %v2453_v40  ;;  %v446_v13 = vor.u32 %v2469_v18, %v3804_v37  ;;  %v3807_v19 = vrot.slane %v2453_v40, 1 }
  0x3e   : > { %660 = vrot.lane.b32.xlu1 %v2371_v32, %s2134_s26  ;;  %924 = vrot.lane.b32.xlu0 %v2378_v33, %s2139_s6 }
  0x3f   : > { %1046 = vrot.lane.b32.xlu2 %v989_v43, %s2141_s8  ;;  %v941_v43 = vor.u32 %v940_v35, %v939_v22  ;;  %v2472_v22 = vshll.u32 %v2453_v40, 16  ;;  %v2475_v35 = vshrl.u32 %v2453_v40, 16 }
  0x41   : > { %v720_v17 = vrot.slane %v2475_v35, 1  ;;  %v721_v61 = vrot.slane %v2472_v22, 2 }
  0x46   : > { %1120 = vrot.lane.b32.xlu1 %v1085_v57, %s2137_s29  ;;  %782 = vrot.lane.b32.xlu0 %v703_v8, %s2140_s7  ;;  %v443_v57 = vsel %vm391_vm3, %v438_v20, %v3723_v21  ;;  %v945_v8 = vsel %vm938_vm5, %v941_v43, %v2450_v46  ;;  %v588_v20 = vrot.slane %v2406_v54, 1  ;;  %v3724_v43 = vrot.slane %v2453_v40, 1 }
  0x47   : > { %856 = vrot.lane.b32.xlu2 %v821_v59, %s2136_s28  ;;  %v2461_v59 = vsel %vm818_vm1, %v820_v47, %v3720_v42  ;;  %v1061_v47 = vrot.slane %v2347_v5, 3  ;;  %v3727_v42 = vrot.slane %v2406_v54, 2  ;;  %v2515_v21 = vshll.u32 %v2496_v6, 16 }
  0x48   : > { %v2493_v7 = vsel %vm576_vm0, %v3722_v38, %v588_v20  ;;  %v2501_v10 = vsel %vm576_vm0, %v588_v20, %v3724_v43  ;;  %v2510_v38 = vor.u32 %v721_v61, %v720_v17  ;;  %v2518_v20 = vshrl.u32 %v2496_v6, 16 }
  0x49   : > { %3793 = vst [vmem:[#allocation15_spill] sm:$0xff] %v2493_v7  ;;  %v958_v17 = vrot.slane %v2475_v35, 2  ;;  %v959_v61 = vrot.slane %v2472_v22, 3  ;;  %v963_v23 = vrot.slane %v2515_v21, 3 }
  0x4b   : > { %v2546_v25 = vor.u32 %v959_v61, %v958_v17  ;;  %v3732_v17 = vrot.slane %v2453_v40, 3  ;;  %v3733_v61 = vrot.slane %v2496_v6, 3 }
  0x4d   : > { %3796 = vst [vmem:[#allocation18_spill] sm:$0xff] %v2546_v25 }
  0x4e   : > { %550 = vrot.lane.b32.xlu1 %v443_v57, %s2138_s30  ;;  %902 = vrot.lane.b32.xlu0 %v2461_v59, %s2139_s6  ;;  %v716_v57 = vrot.slane %v2469_v18, 1 }
  0x4f   : > { %1024 = vrot.lane.b32.xlu2 %v945_v8, %s2141_s8  ;;  %v1063_v8 = vsel %vm1060_vm2, %v1061_v47, %v3721_v36  ;;  %v830_v47 = vrot.slane %v2453_v40, 2 }
  0x50   : > { %v2508_v36 = vor.u32 %v717_v9, %v716_v57  ;;  %v962_v57 = vrot.slane %v2518_v20, 2 }
  0x51   : > { %v2524_v43 = vsel %vm818_vm1, %v3727_v42, %v830_v47  ;;  %v2029_v42 = vld [vmem:[%s3709_s1 + $0x38] sm:$0xff] }
  0x52   : > { %3794 = vst [vmem:[#allocation16_spill] sm:$0xff] %v2508_v36  ;;  %v723_v9 = vsel %vm696_vm4, %v2508_v36, %v2510_v38  ;;  %v2548_v28 = vor.u32 %v963_v23, %v962_v57  ;;  %2041 = vmatpush.bf16.msra.mxu2 %v2029_v42  ;;  %1552 = vmatpush.bf16.msra.mxu0 %v2029_v42  ;;  %v2027_v23 = vld [vmem:[%s3709_s1 + $0x28] sm:$0xff] }
  0x53   : > { %3795 = vst [vmem:[#allocation17_spill] sm:$0xff] %v2524_v43  ;;  %2040 = vmatpush.bf16.msra.mxu1 %v2029_v42  ;;  %2042 = vmatpush.bf16.msra.mxu3 %v2029_v42  ;;  %v3735_v42 = vrot.slane %v2329_v58, 1 }
  0x56   : > { %1098 = vrot.lane.b32.xlu1 %v1063_v8, %s2137_s29  ;;  %624 = vrot.lane.b32.xlu0 %v2493_v7, %s2135_s27  ;;  %v3730_v8 = vrot.slane %v2496_v6, 2 }
  0x57   : > { %670 = vrot.lane.b32.xlu2 %v2501_v10, %s2134_s26 }
  0x58   : > { %v2536_v26 = vsel %vm818_vm1, %v830_v47, %v3730_v8  ;;  %v2028_v47 = vld [vmem:[%s3709_s1 + $0x30] sm:$0xff]  ;;  %v748_v8 = vrot.slane %v2344_v4, 1 }
  0x59   : > { %2044 = vmatpush.bf16.msra.mxu2 %v2028_v47  ;;  %1553 = vmatpush.bf16.msra.mxu0 %v2028_v47 }
  0x5a   : > { %2043 = vmatpush.bf16.msra.mxu1 %v2028_v47  ;;  %2045 = vmatpush.bf16.msra.mxu3 %v2028_v47  ;;  %v2569_v57 = vor.u32 %v749_v49, %v748_v8  ;;  %v1073_v49 = vsel %vm1060_vm2, %v3732_v17, %v3733_v61 }
  0x5c   : > { %v751_v8 = vsel %vm696_vm4, %v2315_v52, %v2569_v57  ;;  %v3799_v52 = vshrl.u32 %v2312_v50, 16 }
  0x5d   : > { %2047 = vmatpush.bf16.msra.mxu2 %v2027_v23  ;;  %1554 = vmatpush.bf16.msra.mxu0 %v2027_v23 }
  0x5e   : > { %866 = vrot.lane.b32.xlu1 %v2524_v43, %s2136_s28  ;;  %792 = vrot.lane.b32.xlu0 %v723_v9, %s2140_s7  ;;  %v965_v9 = vsel %vm938_vm5, %v2546_v25, %v2548_v28 }
  0x5f   : > { %912 = vrot.lane.b32.xlu2 %v2536_v26, %s2139_s6  ;;  %2046 = vmatpush.bf16.msra.mxu1 %v2027_v23 }
  0x60   : > { %2048 = vmatpush.bf16.msra.mxu3 %v2027_v23  ;;  %v406_v23 = vor.u32 %v3799_v52, %v2336_v60 }
  0x66   : > { %1034 = vrot.lane.b32.xlu1 %v965_v9, %s2141_s8  ;;  %564 = vrot.lane.b32.xlu0 %v2440_v41, %s2138_s30  ;;  %v2026_v41 = vld [vmem:[%s3709_s1 + $0x20] sm:$0xff]  ;;  %v2590_v9 = vld [vmem:[%s2197_s25 + $0x78] sm:$0xff] }
  0x67   : > { %638 = vrot.lane.b32.xlu2 %v2322_v53, %s2135_s27  ;;  %v3797_v53 = vrot.slane %v2209_v3, 1  ;;  %3798 = vst [vmem:[#allocation19_spill] sm:$0xff] %v2590_v9  ;;  %2050 = vmatpush.bf16.msra.mxu2 %v2026_v41  ;;  %v2025_v3 = vld [vmem:[%s3709_s1 + $0x18] sm:$0xff]  ;;  %v2604_v17 = vshll.u32 %v2590_v9, 16 }
  0x68   : > { %1555 = vmatpush.bf16.msra.mxu0 %v2026_v41  ;;  %2049 = vmatpush.bf16.msra.mxu1 %v2026_v41 }
  0x69   : > { %v2579_v47 = vsel %vm576_vm0, %v3797_v53, %v3735_v42  ;;  %2051 = vmatpush.bf16.msra.mxu3 %v2026_v41  ;;  %v3734_v53 = vrot.slane %v2361_v29, 1  ;;  %v2607_v41 = vshrl.u32 %v2590_v9, 16  ;;  %v991_v61 = vrot.slane %v2604_v17, 3 }
  0x6b   : > { %2053 = vmatpush.bf16.msra.mxu2 %v2025_v3  ;;  %v411_v60 = vsel %vm391_vm3, %v406_v23, %v3734_v53  ;;  %v990_v52 = vrot.slane %v2607_v41, 2  ;;  %v3739_v23 = vrot.slane %v2390_v44, 1  ;;  %v3740_v53 = vrot.slane %v2590_v9, 2 }
  0x6c   : > { %1556 = vmatpush.bf16.msra.mxu0 %v2025_v3  ;;  %2052 = vmatpush.bf16.msra.mxu1 %v2025_v3 }
  0x6d   : > { %2054 = vmatpush.bf16.msra.mxu3 %v2025_v3  ;;  %v2023_v3 = vld [vmem:[%s3709_s1 + $0x8] sm:$0xff]  ;;  %v2629_v42 = vor.u32 %v991_v61, %v990_v52  ;;  %v3801_v61 = vrot.slane %v2329_v58, 2 }
  0x6e   : > { %684 = vrot.lane.b32.xlu1 %v2579_v47, %s2134_s26  ;;  %1108 = vrot.lane.b32.xlu0 %v1073_v49, %s2137_s29 }
  0x6f   : > { %806 = vrot.lane.b32.xlu2 %v751_v8, %s2140_s7  ;;  %v2024_v8 = vld [vmem:[%s3709_s1 + $0x10] sm:$0xff]  ;;  %v2648_v52 = vsel %vm818_vm1, %v3801_v61, %v3740_v53  ;;  %v993_v1 = vsel %vm938_vm5, %v2366_v31, %v2629_v42  ;;  %v2667_v31 = vshll.u32 %v2656_v39, 16  ;;  %v2670_v61 = vshrl.u32 %v2656_v39, 16 }
  0x70   : > { %2056 = vmatpush.bf16.msra.mxu2 %v2024_v8  ;;  %1557 = vmatpush.bf16.msra.mxu0 %v2024_v8 }
  0x71   : > { %v2609_v49 = vpop.permute.xlu2 %876  ;;  %2055 = vmatpush.bf16.msra.mxu1 %v2024_v8  ;;  %2057 = vmatpush.bf16.msra.mxu3 %v2024_v8  ;;  %3802 = vst [vmem:[#allocation20_spill] sm:$0xff] %v2670_v61 }
  0x74   : > { %2059 = vmatpush.bf16.msra.mxu2 %v2023_v3  ;;  %1558 = vmatpush.bf16.msra.mxu0 %v2023_v3 }
  0x75   : > { %2058 = vmatpush.bf16.msra.mxu1 %v2023_v3  ;;  %2060 = vmatpush.bf16.msra.mxu3 %v2023_v3  ;;  %v704_v3 = vrot.slane %v2412_v56, 1 }
  0x76   : > { %880 = vrot.lane.b32.xlu1 %v2378_v33, %s2136_s28  ;;  %542 = vrot.lane.b32.xlu0 %v411_v60, %s2138_s30  ;;  %v2022_v33 = vld [vmem:[%s3709_s1] sm:$0xff] }
  0x77   : > { %616 = vrot.lane.b32.xlu2 %v2371_v32, %s2135_s27  ;;  %v3800_v32 = vrot.slane %v2347_v5, 1  ;;  %v3743_v5 = vrot.slane %v2590_v9, 3 }
  0x78   : > { %2062 = vmatpush.bf16.msra.mxu2 %v2022_v33  ;;  %1559 = vmatpush.bf16.msra.mxu0 %v2022_v33 }
  0x79   : > { %v2631_v8 = vpop.permute.xlu2 %922  ;;  %v2641_v60 = vsel %vm576_vm0, %v3800_v32, %v3739_v23  ;;  %2061 = vmatpush.bf16.msra.mxu1 %v2022_v33  ;;  %2063 = vmatpush.bf16.msra.mxu3 %v2022_v33  ;;  %v2664_v32 = vor.u32 %v705_v16, %v704_v3  ;;  %v3803_v33 = vrot.slane %v2329_v58, 3  ;;  %v946_v16 = vrot.slane %v2670_v61, 2 }
  0x7a   : > { %v947_v3 = vrot.slane %v2667_v31, 3 }
  0x7b   : > { %v1087_v53 = vsel %vm1060_vm2, %v3803_v33, %v3743_v5  ;;  %v3748_v33 = vrot.slane %v2472_v22, 1  ;;  %v3747_v5 = vrot.slane %v2656_v39, 2 }
  0x7c   : > { %v2693_v43 = vor.u32 %v947_v3, %v946_v16 }
  0x7e   : > { %662 = vrot.lane.b32.xlu1 %v2641_v60, %s2134_s26  ;;  %926 = vrot.lane.b32.xlu0 %v2648_v52, %s2139_s6 }
  0x7f   : > { %1048 = vrot.lane.b32.xlu2 %v993_v1, %s2141_s8  ;;  %v707_v1 = vsel %vm696_vm4, %v2403_v51, %v2664_v32 }
  0x81   : > { %v2672_v23 = vpop.permute.xlu2 %562 }
  0x86   : > { %1122 = vrot.lane.b32.xlu1 %v1087_v53, %s2137_s29  ;;  %784 = vrot.lane.b32.xlu0 %v707_v1, %s2140_s7  ;;  %v451_v53 = vsel %vm391_vm3, %v446_v13, %v3748_v33  ;;  %v949_v1 = vsel %vm938_vm5, %v2450_v46, %v2693_v43  ;;  %v3755_v13 = vrot.slane %v2656_v39, 3  ;;  %v725_v33 = vrot.slane %v2515_v21, 2 }
  0x87   : > { %858 = vrot.lane.b32.xlu2 %v2461_v59, %s2136_s28  ;;  %v3805_v59 = vrot.slane %v2390_v44, 2 }
  0x88   : > { %v681_v51 = vpop.permute.xlu1 %680  ;;  %v635_v25 = vpop.permute.xlu0 %634 }
  0x89   : > { %v2695_v7 = vpop.permute.xlu2 %804  ;;  %v2705_v37 = vsel %vm818_vm1, %v3805_v59, %v3747_v5  ;;  %v3754_v59 = vrot.slane %v2496_v6, 1 }
  0x8b   : > { %v2735_v12 = vsel %vm576_vm0, %v3807_v19, %v3754_v59  ;;  %v2749_v19 = vshrl.u32 %v2728_v15, 16  ;;  %v3757_v59 = vrot.slane %v2604_v17, 1 }
  0x8d   : > { %3808 = vst [vmem:[#allocation21_spill] sm:$0xff] %v2749_v19 }
  0x8e   : > { %552 = vrot.lane.b32.xlu1 %v451_v53, %s2138_s30  ;;  %904 = vrot.lane.b32.xlu0 %v2705_v37, %s2139_s6  ;;  %v724_v53 = vrot.slane %v2518_v20, 1 }
  0x8f   : > { %1026 = vrot.lane.b32.xlu2 %v949_v1, %s2141_s8  ;;  %v3806_v1 = vrot.slane %v2390_v44, 3 }
  0x90   : > { %v1119_v16 = vpop.permute.xlu1 %1118  ;;  %v561_v3 = vpop.permute.xlu0 %560 }
  0x91   : > { %v2716_v5 = vpop.permute.xlu2 %614  ;;  %v1156_v46 = vsel %vm1134_vm6, %v2206_v2, %v561_v3  ;;  %v1065_v36 = vsel %vm1060_vm2, %v3806_v1, %v3755_v13  ;;  %v2741_v2 = vor.u32 %v725_v33, %v724_v53  ;;  %v2746_v1 = vshll.u32 %v2728_v15, 16 }
  0x92   : > { %v1193_v3 = vsel %vm1171_vm7, %v1156_v46, %v635_v25 }
  0x93   : > { %v1230_v46 = vsel %vm1208_vm8, %v1193_v3, %v681_v51  ;;  %v727_v40 = vsel %vm696_vm4, %v2510_v38, %v2741_v2  ;;  %v966_v3 = vrot.slane %v2749_v19, 2  ;;  %v3809_v38 = vrot.slane %v2496_v6, 2 }
  0x96   : > { %1100 = vrot.lane.b32.xlu1 %v1065_v36, %s2137_s29  ;;  %626 = vrot.lane.b32.xlu0 %v2501_v10, %s2135_s27  ;;  %v3758_v10 = vrot.slane %v2728_v15, 2 }
  0x97   : > { %672 = vrot.lane.b32.xlu2 %v2735_v12, %s2134_s26 }
  0x98   : > { %v803_v25 = vpop.permute.xlu1 %802  ;;  %v1045_v36 = vpop.permute.xlu0 %1044 }
  0x99   : > { %v1267_v33 = vsel %vm1245_vm9, %v1230_v46, %v803_v25  ;;  %v2754_v53 = vpop.permute.xlu2 %1046  ;;  %v967_v25 = vrot.slane %v2746_v1, 3  ;;  %v2769_v46 = vor.u32 %v2607_v41, %v3757_v59 }
  0x9a   : > { %v1304_v13 = vsel %vm1282_vm10, %v1267_v33, %v2609_v49  ;;  %v2777_v33 = vsel %vm818_vm1, %v3809_v38, %v3758_v10  ;;  %v1158_v10 = vsel %vm1134_vm6, %v2200_v0, %v2672_v23  ;;  %v2839_v23 = vld [vmem:[%s2197_s25 + $0x80] sm:$0xff] }
  0x9b   : > { %v1341_v51 = vsel %vm1319_vm11, %v1304_v13, %v2631_v8 }
  0x9c   : > { %v1378_v49 = vsel %vm1356_vm12, %v1341_v51, %v1045_v36  ;;  %v2787_v36 = vor.u32 %v967_v25, %v966_v3  ;;  %v3810_v51 = vrot.slane %v2264_v24, 1  ;;  %v752_v3 = vrot.slane %v2607_v41, 1 }
  0x9d   : > { %v1415_v8 = vsel %vm1393_vm13, %v1378_v49, %v1119_v16  ;;  %v3760_v16 = vrot.slane %v2341_v63, 1  ;;  %v753_v24 = vrot.slane %v2604_v17, 2  ;;  %v3811_v41 = vrot.slane %v2329_v58, 1 }
  0x9e   : > { %868 = vrot.lane.b32.xlu1 %v2536_v26, %s2136_s28  ;;  %794 = vrot.lane.b32.xlu0 %v727_v40, %s2140_s7  ;;  %v1442_v13 = vsel %vm1430_vm14, %v1415_v8, 1065369472  ;;  %v502_v38 = vor.u32 %v2273_v27, %v3810_v51  ;;  %v969_v40 = vsel %vm938_vm5, %v2548_v28, %v2787_v36  ;;  %v606_v27 = vrot.slane %v2590_v9, 1 }
  0x9f   : > { %1993 = vmatmul.msk.bf16.vlgmr.msra.gmra.mxu2 %vm1450_vm15, %v1442_v13  ;;  %914 = vrot.lane.b32.xlu2 %v2777_v33, %s2139_s6  ;;  %v3759_v28 = vrot.slane %v2728_v15, 3  ;;  %v2809_v51 = vor.u32 %v753_v24, %v752_v3  ;;  %v3813_v58 = vrot.slane %v2361_v29, 1  ;;  %v2850_v29 = vshll.u32 %v2839_v23, 16 }
  0xa0   : > { %v683_v49 = vpop.permute.xlu1 %682  ;;  %v637_v59 = vpop.permute.xlu0 %636  ;;  %v507_v8 = vsel %vm391_vm3, %v502_v38, %v3760_v16 }
  0xa1   : > { %v2793_v26 = vpop.permute.xlu2 %856  ;;  %v755_v3 = vsel %vm696_vm4, %v2569_v57, %v2809_v51  ;;  %v1195_v24 = vsel %vm1171_vm7, %v1158_v10, %v637_v59 }
  0xa6   : > { %1036 = vrot.lane.b32.xlu1 %v969_v40, %s2141_s8  ;;  %566 = vrot.lane.b32.xlu0 %v507_v8, %s2138_s30  ;;  %v2816_v40 = vsel %vm576_vm0, %v3811_v41, %v606_v27  ;;  %v414_v41 = vor.u32 %v2364_v30, %v3813_v58  ;;  %v3761_v58 = vrot.slane %v2656_v39, 1 }
  0xa7   : > { %640 = vrot.lane.b32.xlu2 %v2579_v47, %s2135_s27  ;;  %v3812_v47 = vrot.slane %v2496_v6, 3 }
  0xa8   : > { %v879_v25 = vpop.permute.xlu1 %878  ;;  %v541_v13 = vpop.permute.xlu0 %540 }
  0xa9   : > { %v2811_v38 = vpop.permute.xlu2 %1024  ;;  %v1075_v8 = vsel %vm1060_vm2, %v3812_v47, %v3759_v28  ;;  %v3763_v47 = vrot.slane %v2409_v55, 1  ;;  %v1232_v28 = vsel %vm1208_vm8, %v1195_v24, %v683_v49  ;;  %v3764_v49 = vrot.slane %v2839_v23, 2 }
  0xaa   : > { %v1269_v10 = vsel %vm1245_vm9, %v1232_v28, %v2695_v7  ;;  %v3762_v7 = vrot.slane %v2850_v29, 1  ;;  %v2862_v28 = vshrl.u32 %v2839_v23, 16 }
  0xab   : > { %v1306_v30 = vsel %vm1282_vm10, %v1269_v10, %v879_v25 }
  0xac   : > { %v523_v10 = vsel %vm391_vm3, %v2769_v46, %v3762_v7 }
  0xae   : > { %686 = vrot.lane.b32.xlu1 %v2816_v40, %s2134_s26  ;;  %1110 = vrot.lane.b32.xlu0 %v1075_v8, %s2137_s29  ;;  %v419_v8 = vsel %vm391_vm3, %v414_v41, %v3763_v47 }
  0xaf   : > { %808 = vrot.lane.b32.xlu2 %v755_v3, %s2140_s7 }
  0xb0   : > { %v661_v57 = vpop.permute.xlu1 %660  ;;  %v925_v16 = vpop.permute.xlu0 %924 }
  0xb1   : > { %v2842_v59 = vpop.permute.xlu2 %670  ;;  %v1343_v3 = vsel %vm1319_vm11, %v1306_v30, %v925_v16  ;;  %v994_v30 = vrot.slane %v2862_v28, 2 }
  0xb2   : > { %v1380_v25 = vsel %vm1356_vm12, %v1343_v3, %v2754_v53  ;;  %v3814_v53 = vrot.slane %v2590_v9, 2  ;;  %v995_v3 = vrot.slane %v2850_v29, 3 }
  0xb6   : > { %882 = vrot.lane.b32.xlu1 %v2648_v52, %s2136_s28  ;;  %544 = vrot.lane.b32.xlu0 %v419_v8, %s2138_s30  ;;  %v2881_v8 = vsel %vm818_vm1, %v3814_v53, %v3764_v49  ;;  %v2913_v49 = vld [vmem:[%s2197_s25 + $0x88] sm:$0xff] }
  0xb7   : > { %618 = vrot.lane.b32.xlu2 %v2641_v60, %s2135_s27 }
  0xb8   : > { %v1121_v24 = vpop.permute.xlu1 %1120  ;;  %v783_v16 = vpop.permute.xlu0 %782 }
  0xb9   : > { %v1417_v52 = vsel %vm1393_vm13, %v1380_v25, %v1121_v24  ;;  %v2868_v41 = vpop.permute.xlu2 %912  ;;  %v1136_v24 = vsel %vm1134_vm6, %v2300_v45, %v541_v13  ;;  %v3815_v25 = vrot.slane %v2390_v44, 1  ;;  %v608_v44 = vrot.slane %v2839_v23, 1 }
  0xba   : > { %v1443_v60 = vsel %vm1430_vm14, %v1417_v52, 1065369472  ;;  %v708_v52 = vrot.slane %v2670_v61, 1  ;;  %v1173_v45 = vsel %vm1171_vm7, %v1136_v24, %v2716_v5  ;;  %v2904_v13 = vor.u32 %v995_v3, %v994_v30 }
  0xbb   : > { %1994 = vmatmul.msk.bf16.gmra.mxu2 %vm1450_vm15, %v1443_v60  ;;  %v2892_v46 = vsel %vm576_vm0, %v3815_v25, %v3761_v58  ;;  %v709_v60 = vrot.slane %v2667_v31, 2  ;;  %v1210_v53 = vsel %vm1208_vm8, %v1173_v45, %v661_v57  ;;  %v2916_v5 = vsel %vm576_vm0, %v606_v27, %v608_v44 }
  0xbc   : > { %v997_v30 = vsel %vm938_vm5, %v2629_v42, %v2904_v13  ;;  %v2931_v27 = vrot.slane %v2913_v49, 1  ;;  %v3765_v24 = vrot.slane %v2839_v23, 3  ;;  %v2936_v42 = vshll.u32 %v2913_v49, 16 }
  0xbd   : > { %v2907_v7 = vor.u32 %v709_v60, %v708_v52  ;;  %v3771_v61 = vrot.slane %v2515_v21, 1 }
  0xbe   : > { %570 = vrot.lane.b32.xlu1 %v523_v10, %s2138_s30  ;;  %928 = vrot.lane.b32.xlu0 %v2881_v8, %s2139_s6  ;;  %v1247_v10 = vsel %vm1245_vm9, %v1210_v53, %v783_v16 }
  0xbf   : > { %664 = vrot.lane.b32.xlu2 %v2892_v46, %s2134_s26  ;;  %v1284_v57 = vsel %vm1282_vm10, %v1247_v10, %v2793_v26  ;;  %v711_v3 = vsel %vm696_vm4, %v2664_v32, %v2907_v7  ;;  %v2939_v26 = vshrl.u32 %v2913_v49, 16  ;;  %v2949_v10 = vsel %vm576_vm0, %v608_v44, %v2931_v27 }
  0xc0   : > { %v551_v25 = vpop.permute.xlu1 %550  ;;  %v903_v58 = vpop.permute.xlu0 %902  ;;  %v3769_v44 = vrot.slane %v2381_v34, 2 }
  0xc1   : > { %v2910_v47 = vpop.permute.xlu2 %638  ;;  %v1321_v16 = vsel %vm1319_vm11, %v1284_v57, %v903_v58  ;;  %3816 = vst [vmem:[#allocation22_spill] sm:$0xff] %v2939_v26 }
  0xc2   : > { %v1358_v58 = vsel %vm1356_vm12, %v1321_v16, %v2811_v38  ;;  %v756_v38 = vrot.slane %v2862_v28, 1  ;;  %v760_v16 = vrot.slane %v2939_v26, 1 }
  0xc6   : > { %644 = vrot.lane.b32.xlu1 %v2916_v5, %s2135_s27  ;;  %1050 = vrot.lane.b32.xlu0 %v997_v30, %s2141_s8  ;;  %v3817_v30 = vrot.slane %v2590_v9, 3 }
  0xc7   : > { %786 = vrot.lane.b32.xlu2 %v711_v3, %s2140_s7  ;;  %v757_v3 = vrot.slane %v2850_v29, 2 }
  0xc8   : > { %v1099_v32 = vpop.permute.xlu1 %1098  ;;  %v625_v52 = vpop.permute.xlu0 %624  ;;  %v1089_v57 = vsel %vm1060_vm2, %v3817_v30, %v3765_v24  ;;  %v3818_v24 = vrot.slane %v2472_v22, 1  ;;  %v951_v22 = vrot.slane %v2400_v48, 3 }
  0xc9   : > { %v1395_v60 = vsel %vm1393_vm13, %v1358_v58, %v1099_v32  ;;  %v2944_v45 = vpop.permute.xlu2 %806  ;;  %v761_v32 = vrot.slane %v2936_v42, 2  ;;  %v2967_v58 = vor.u32 %v757_v3, %v756_v38  ;;  %v950_v3 = vrot.slane %v2422_v62, 2 }
  0xca   : > { %v1432_v53 = vsel %vm1430_vm14, %v1395_v60, 1065369472  ;;  %v454_v9 = vor.u32 %v2475_v35, %v3818_v24  ;;  %v1146_v35 = vsel %vm1134_vm6, %v2381_v34, %v551_v25 }
  0xcb   : > { %1983 = vmatmul.msk.bf16.vlgmr.msra.gmra.mxu0 %vm1450_vm15, %v1432_v53  ;;  %v2969_v60 = vor.u32 %v761_v32, %v760_v16  ;;  %v1183_v16 = vsel %vm1171_vm7, %v1146_v35, %v625_v52  ;;  %v2999_v32 = vor.u32 %v951_v22, %v950_v3  ;;  %v3016_v22 = vld [vmem:[%s2197_s25 + $0x90] sm:$0xff]  }
  0xcc   : > { %v459_v24 = vsel %vm391_vm3, %v454_v9, %v3771_v61  ;;  %v1220_v25 = vsel %vm1208_vm8, %v1183_v16, %v2842_v59 }
  0xcd   : > { %v763_v38 = vsel %vm696_vm4, %v2967_v58, %v2969_v60  ;;  %3820 = vst [vmem:[#allocation23_spill] sm:$0xff] %v2999_v32  ;;  %v953_v52 = vsel %vm938_vm5, %v2693_v43, %v2999_v32  ;;  %v3823_v32 = vrot.slane %v2381_v34, 3 }
  0xce   : > { %690 = vrot.lane.b32.xlu1 %v2949_v10, %s2134_s26  ;;  %1124 = vrot.lane.b32.xlu0 %v1089_v57, %s2137_s29 }
  0xcf   : > { %860 = vrot.lane.b32.xlu2 %v2705_v37, %s2136_s28  ;;  %v3819_v37 = vrot.slane %v2656_v39, 2 }
  0xd0   : > { %v867_v53 = vpop.permute.xlu1 %866  ;;  %v793_v30 = vpop.permute.xlu0 %792 }
  0xd1   : > { %v2975_v0 = vpop.permute.xlu2 %616  ;;  %v2982_v57 = vsel %vm818_vm1, %v3819_v37, %v3769_v44  ;;  %v850_v37 = vrot.slane %v2913_v49, 2  ;;  %v1257_v9 = vsel %vm1245_vm9, %v1220_v25, %v793_v30  ;;  %v3024_v30 = vrot.slane %v3016_v22, 2 }
  0xd2   : > { %v1294_v35 = vsel %vm1282_vm10, %v1257_v9, %v867_v53 }
  0xd3   : > { %3822 = vst [vmem:[#allocation24_spill] sm:$0xff] %v3024_v30  ;;  %v1331_v43 = vsel %vm1319_vm11, %v1294_v35, %v2868_v41  ;;  %v3824_v41 = vrot.slane %v2656_v39, 3  ;;  %v3045_v53 = vsel %vm818_vm1, %v850_v37, %v3024_v30 }
  0xd6   : > { %906 = vrot.lane.b32.xlu1 %v2982_v57, %s2139_s6  ;;  %812 = vrot.lane.b32.xlu0 %v763_v38, %s2140_s7  ;;  %v3821_v38 = vrot.slane %v2839_v23, 2 }
  0xd7   : > { %554 = vrot.lane.b32.xlu2 %v459_v24, %s2138_s30  ;;  %v3774_v24 = vshrl.u32 %v3016_v22, 16 }
  0xd8   : > { %v1035_v44 = vpop.permute.xlu1 %1034  ;;  %v565_v18 = vpop.permute.xlu0 %564  ;;  %v3013_v3 = vsel %vm818_vm1, %v3821_v38, %v850_v37  ;;  %v3826_v37 = vrot.slane %v2728_v15, 1 }
  0xd9   : > { %v3005_v61 = vpop.permute.xlu2 %1048  ;;  %v1368_v16 = vsel %vm1356_vm12, %v1331_v43, %v1035_v44  ;;  %v728_v44 = vrot.slane %v2749_v19, 1  ;;  %v729_v43 = vrot.slane %v2746_v1, 2 }
  0xde   : > { %1028 = vrot.lane.b32.xlu1 %v953_v52, %s2141_s8  ;;  %886 = vrot.lane.b32.xlu0 %v3013_v3, %s2136_s28  ;;  %v1002_v52 = vrot.slane %v3774_v24, 2 }
  0xdf   : > { %628 = vrot.lane.b32.xlu2 %v2735_v12, %s2135_s27  ;;  %v1067_v12 = vsel %vm1060_vm2, %v3824_v41, %v3823_v32  ;;  %v3825_v32 = vshll.u32 %v3016_v22, 16  ;;  %v3827_v41 = vrot.slane %v2496_v6, 1 }
  0xe0   : > { %v685_v25 = vpop.permute.xlu1 %684  ;;  %v1109_v9 = vpop.permute.xlu0 %1108 }
  0xe1   : > { %v1405_v38 = vsel %vm1393_vm13, %v1368_v16, %v1109_v9  ;;  %v3035_v59 = vpop.permute.xlu2 %858  ;;  %v998_v16 = vrot.slane %v2939_v26, 2  ;;  %v999_v9 = vrot.slane %v2936_v42, 3  ;;  %v3061_v19 = vsel %vm576_vm0, %v3827_v41, %v3826_v37 }
  0xe2   : > { %v1437_v35 = vsel %vm1430_vm14, %v1405_v38, 1065369472  ;;  %v1003_v38 = vrot.slane %v3825_v32, 3  ;;  %v1090_v37 = vrot.slane %v2913_v49, 3  ;;  %v3780_v41 = vrot.slane %v3016_v22, 3 }
  0xe3   : > { %1988 = vmatmul.msk.bf16.vlgmr.msra.gmra.mxu1 %vm1450_vm15, %v1437_v35  ;;  %v3068_v35 = vor.u32 %v729_v43, %v728_v44  ;;  %v3070_v24 = vor.u32 %v999_v9, %v998_v16  ;;  %v2098_v43 = vld [vmem:[%s2197_s25 + $0x60] sm:$0xff]  ;;  %v3095_v9 = vld [vmem:[%s2197_s25 + $0x50] sm:$0xff] }
  0xe4   : > { %v3072_v32 = vor.u32 %v1003_v38, %v1002_v52  ;;  %v1160_v16 = vsel %vm1134_vm6, %v2098_v43, %v565_v18  ;;  %v1093_v52 = vsel %vm1060_vm2, %v1090_v37, %v3780_v41  ;;  %v836_v38 = vrot.slane %v3095_v9, 2 }
  0xe5   : > { %3828 = vst [vmem:[#allocation25_spill] sm:$0xff] %v3068_v35  ;;  %v731_v30 = vsel %vm696_vm4, %v2741_v2, %v3068_v35  ;;  %v1197_v2 = vsel %vm1171_vm7, %v1160_v16, %v2910_v47  ;;  %v3831_v47 = vrot.slane %v2728_v15, 2 }
  0xe6   : > { %1102 = vrot.lane.b32.xlu1 %v1067_v12, %s2137_s29  ;;  %932 = vrot.lane.b32.xlu0 %v3045_v53, %s2139_s6  ;;  %3829 = vst [vmem:[#allocation26_spill] sm:$0xff] %v3072_v32  ;;  %v1005_v44 = vsel %vm938_vm5, %v3070_v24, %v3072_v32  ;;  %v1234_v18 = vsel %vm1208_vm8, %v1197_v2, %v685_v25  ;;  %v3830_v32 = vrot.slane %v2341_v63, 1  ;;  %v970_v25 = vrot.slane %v2232_v14, 2 }
  0xe7   : > { %674 = vrot.lane.b32.xlu2 %v3061_v19, %s2134_s26  ;;  %v3111_v16 = vsel %vm818_vm1, %v3831_v47, %v836_v38 }
  0xe8   : > { %v881_v26 = vpop.permute.xlu1 %880  ;;  %v543_v6 = vpop.permute.xlu0 %542  ;;  %v510_v41 = vor.u32 %v2344_v4, %v3830_v32  ;;  %v3832_v4 = vrot.slane %v2604_v17, 1  ;;  %v1076_v17 = vrot.slane %v3095_v9, 3 }
  0xe9   : > { %v1027_v12 = vpop.permute.xlu2 %1026 }
  0xea   : > { %v515_v32 = vsel %vm391_vm3, %v510_v41, %v3832_v4 }
  0xee   : > { %796 = vrot.lane.b32.xlu1 %v731_v30, %s2140_s7  ;;  %1054 = vrot.lane.b32.xlu0 %v1005_v44, %s2141_s8  ;;  %v1271_v44 = vsel %vm1245_vm9, %v1234_v18, %v2944_v45 }
  0xef   : > { %1128 = vrot.lane.b32.xlu2 %v1093_v52, %s2137_s29  ;;  %v971_v52 = vrot.slane %v2219_v11, 3  ;;  %v1308_v63 = vsel %vm1282_vm10, %v1271_v44, %v881_v26 }
  0xf0   : > { %v663_v43 = vpop.permute.xlu1 %662  ;;  %v927_v35 = vpop.permute.xlu0 %926 }
  0xf1   : > { %v3102_v30 = vpop.permute.xlu2 %672  ;;  %v1345_v2 = vsel %vm1319_vm11, %v1308_v63, %v927_v35  ;;  %v3125_v45 = vor.u32 %v971_v52, %v970_v25  ;;  %v1138_v25 = vsel %vm1134_vm6, %v2312_v50, %v543_v6  ;;  %v3834_v6 = vrot.slane %v2409_v55, 1 }
  0xf2   : > { %v1382_v26 = vsel %vm1356_vm12, %v1345_v2, %v3005_v61  ;;  %v3833_v61 = vrot.slane %v2728_v15, 3  ;;  %v1175_v63 = vsel %vm1171_vm7, %v1138_v25, %v2975_v0  ;;  %v426_v2 = vrot.slane %v2667_v31, 1 }
  0xf3   : > { %v759_v0 = vsel %vm696_vm4, %v2809_v51, %v2967_v58  ;;  %v3861_v31 = vrot.slane %v2400_v48, 1 }
  0xf4   : > { %v1077_v52 = vsel %vm1060_vm2, %v3833_v61, %v1076_v17 }
  0xf6   : > { %916 = vrot.lane.b32.xlu1 %v3111_v16, %s2139_s6  ;;  %870 = vrot.lane.b32.xlu0 %v2777_v33, %s2136_s28  ;;  %v973_v33 = vsel %vm938_vm5, %v2787_v36, %v3125_v45  ;;  %v1212_v36 = vsel %vm1208_vm8, %v1175_v63, %v663_v43 }
  0xf7   : > { %568 = vrot.lane.b32.xlu2 %v515_v32, %s2138_s30  ;;  %v422_v32 = vor.u32 %v2412_v56, %v3834_v6 }
  0xf8   : > { %v1123_v18 = vpop.permute.xlu1 %1122  ;;  %v785_v44 = vpop.permute.xlu0 %784 }
  0xf9   : > { %v1419_v41 = vsel %vm1393_vm13, %v1382_v26, %v1123_v18  ;;  %v3131_v35 = vpop.permute.xlu2 %914  ;;  %v1249_v18 = vsel %vm1245_vm9, %v1212_v36, %v785_v44  ;;  %v427_v43 = vsel %vm391_vm3, %v422_v32, %v426_v2  ;;  %v1001_v36 = vsel %vm938_vm5, %v2904_v13, %v3070_v24 }
  0xfa   : > { %v1444_v47 = vsel %vm1430_vm14, %v1419_v41, 1065369472  ;;  %v1286_v26 = vsel %vm1282_vm10, %v1249_v18, %v3035_v59 }
  0xfb   : > { %1995 = vmatmul.msk.bf16.gmra.mxu2 %vm1450_vm15, %v1444_v47  ;;  %v530_v47 = vrot.slane %v2936_v42, 1 }
  0xfe   : > { %642 = vrot.lane.b32.xlu1 %v2816_v40, %s2135_s27  ;;  %1038 = vrot.lane.b32.xlu0 %v973_v33, %s2141_s8 }
  0xff   : > { %1112 = vrot.lane.b32.xlu2 %v1077_v52, %s2137_s29  ;;  %v3836_v52 = vrot.slane %v2381_v34, 1 }
 0x100   : > { %v553_v4 = vpop.permute.xlu1 %552  ;;  %v905_v50 = vpop.permute.xlu0 %904 }
 0x101   : > { %v3157_v40 = vpop.permute.xlu2 %640  ;;  %v1323_v55 = vsel %vm1319_vm11, %v1286_v26, %v905_v50 }
 0x102   : > { %v1360_v44 = vsel %vm1356_vm12, %v1323_v55, %v1027_v12  ;;  %v3840_v55 = vshll.u32 %v3016_v22, 16 }
 0x106   : > { %810 = vrot.lane.b32.xlu1 %v759_v0, %s2140_s7  ;;  %688 = vrot.lane.b32.xlu0 %v2916_v5, %s2134_s26  ;;  %v3835_v5 = vrot.slane %v2850_v29, 1  ;;  %v712_v29 = vrot.slane %v2422_v62, 1  ;;  %v3838_v0 = vrot.slane %v2839_v23, 3 }
 0x107   : > { %546 = vrot.lane.b32.xlu2 %v427_v43, %s2138_s30 }
 0x108   : > { %v1101_v56 = vpop.permute.xlu1 %1100  ;;  %v627_v51 = vpop.permute.xlu0 %626  ;;  %v526_v12 = vor.u32 %v2862_v28, %v3835_v5  ;;  %v713_v28 = vrot.slane %v2400_v48, 2  ;;  %v1091_v26 = vsel %vm1060_vm2, %v3838_v0, %v1090_v37 }
 0x109   : > { %v1397_v58 = vsel %vm1393_vm13, %v1360_v44, %v1101_v56  ;;  %v3174_v59 = vpop.permute.xlu2 %808  ;;  %v770_v56 = vrot.slane %v3840_v55, 2  ;;  %v656_v44 = vrot.slane %v3016_v22, 1 }
 0x10a   : > { %v1433_v41 = vsel %vm1430_vm14, %v1397_v58, 1065369472  ;;  %v3212_v50 = vor.u32 %v713_v28, %v712_v29 }
 0x10b   : > { %1984 = vmatmul.msk.bf16.gmra.mxu0 %vm1450_vm15, %v1433_v41 }
 0x10c   : > { %v715_v13 = vsel %vm696_vm4, %v2907_v7, %v3212_v50 }
 0x10e   : > { %620 = vrot.lane.b32.xlu1 %v2892_v46, %s2135_s27  ;;  %884 = vrot.lane.b32.xlu0 %v2881_v8, %s2136_s28  ;;  %v3837_v46 = vrot.slane %v2656_v39, 1  ;;  %v531_v8 = vsel %vm391_vm3, %v526_v12, %v530_v47 }
 0x10f   : > { %930 = vrot.lane.b32.xlu2 %v3013_v3, %s2139_s6  ;;  %v1148_v3 = vsel %vm1134_vm6, %v2406_v54, %v553_v4 }
 0x110   : > { %v869_v33 = vpop.permute.xlu1 %868  ;;  %v795_v25 = vpop.permute.xlu0 %794  ;;  %v3195_v63 = vsel %vm576_vm0, %v3837_v46, %v3836_v52  ;;  %v1185_v39 = vsel %vm1171_vm7, %v1148_v3, %v627_v51  ;;  %v466_v46 = vrot.slane %v2746_v1, 1  ;;  %v3843_v3 = vrot.slane %v2381_v34, 2 }
 0x111   : > { %v3188_v61 = vpop.permute.xlu2 %618  ;;  %v1222_v62 = vsel %vm1208_vm8, %v1185_v39, %v3102_v30  ;;  %v3839_v30 = vshrl.u32 %v3016_v22, 16  ;;  %v3845_v39 = vld [vmem:[#allocation12_spill] sm:$0xff] }
 0x112   : > { %v1259_v32 = vsel %vm1245_vm9, %v1222_v62, %v795_v25  ;;  %v3841_v25 = vrot.slane %v2515_v21, 1  ;;  %v3844_v21 = vld [vmem:[#allocation14_spill] sm:$0xff]  ;;  %v955_v62 = vrot.slane %v3845_v39, 3  ;;  %v3851_v39 = vrot.slane %v2381_v34, 3 }
 0x113   : > { %v1296_v24 = vsel %vm1282_vm10, %v1259_v32, %v869_v33  ;;  %v767_v43 = vrot.slane %v3839_v30, 1 }
 0x114   : > { %v1333_v7 = vsel %vm1319_vm11, %v1296_v24, %v3131_v35  ;;  %v462_v52 = vor.u32 %v2518_v20, %v3841_v25  ;;  %v954_v20 = vrot.slane %v3844_v21, 2  ;;  %v3850_v21 = vrot.slane %v2728_v15, 1 }
 0x115   : > { %v3240_v41 = vor.u32 %v770_v56, %v767_v43  ;;  %v3846_v43 = vld [vmem:[#allocation23_spill] sm:$0xff] }
 0x116   : > { %666 = vrot.lane.b32.xlu1 %v3195_v63, %s2134_s26  ;;  %572 = vrot.lane.b32.xlu0 %v531_v8, %s2138_s30 }
 0x117   : > { %1052 = vrot.lane.b32.xlu2 %v1001_v36, %s2141_s8  ;;  %v772_v35 = vsel %vm696_vm4, %v2969_v60, %v3240_v41  ;;  %v467_v60 = vsel %vm391_vm3, %v462_v52, %v466_v46 }
 0x118   : > { %v1037_v6 = vpop.permute.xlu1 %1036  ;;  %v567_v4 = vpop.permute.xlu0 %566 }
 0x119   : > { %v3217_v18 = vpop.permute.xlu2 %664  ;;  %v1370_v37 = vsel %vm1356_vm12, %v1333_v7, %v1037_v6  ;;  %v3279_v6 = vld [vmem:[%s2197_s25 + $0x98] sm:$0xff]  }
 0x11a   : > { %v898_v24 = vrot.slane %v3279_v6, 2  ;;  %v1007_v0 = vshrl.u32 %v3279_v6, 16 }
 0x11c   : > { %v1009_v7 = vrot.slane %v1007_v0, 2  ;;  %v732_v0 = vrot.slane %v2232_v14, 1  ;;  %v1094_v14 = vrot.slane %v3279_v6, 3 }
 0x11e   : > { %788 = vrot.lane.b32.xlu1 %v715_v13, %s2140_s7  ;;  %646 = vrot.lane.b32.xlu0 %v2949_v10, %s2135_s27  ;;  %v657_v10 = vsel %vm576_vm0, %v2931_v27, %v656_v44 }
 0x11f   : > { %1126 = vrot.lane.b32.xlu2 %v1091_v26, %s2137_s29  ;;  %v1010_v26 = vshll.u32 %v3279_v6, 16 }
 0x120   : > { %v687_v51 = vpop.permute.xlu1 %686  ;;  %v1111_v58 = vpop.permute.xlu0 %1110 }
 0x121   : > { %v1407_v5 = vsel %vm1393_vm13, %v1370_v37, %v1111_v58  ;;  %v3243_v12 = vpop.permute.xlu2 %786  ;;  %v1012_v37 = vrot.slane %v1010_v26, 3  ;;  %v2100_v58 = vld [vmem:[%s2197_s25 + $0x68] sm:$0xff]  ;;  %v3852_v26 = vld [vmem:[#allocation26_spill] sm:$0xff] }
 0x122   : > { %v1438_v33 = vsel %vm1430_vm14, %v1407_v5, 1065369472  ;;  %v1162_v5 = vsel %vm1134_vm6, %v2100_v58, %v567_v4 }
 0x123   : > { %1989 = vmatmul.msk.bf16.gmra.mxu1 %vm1450_vm15, %v1438_v33  ;;  %v3309_v33 = vld [vmem:[%s2197_s25 + $0x30] sm:$0xff]  ;;  %v3314_v52 = vor.u32 %v1012_v37, %v1009_v7 }
 0x126   : > { %862 = vrot.lane.b32.xlu1 %v2982_v57, %s2136_s28  ;;  %692 = vrot.lane.b32.xlu0 %v657_v10, %s2134_s26  ;;  %v3842_v57 = vrot.slane %v2406_v54, 2  ;;  %v3286_v54 = vor.u32 %v955_v62, %v954_v20  ;;  %v1068_v10 = vrot.slane %v3309_v33, 3 }
 0x127   : > { %814 = vrot.lane.b32.xlu2 %v772_v35, %s2140_s7 }
 0x128   : > { %v883_v8 = vpop.permute.xlu1 %882  ;;  %v3262_v29 = vpop.permute.xlu0 %544  ;;  %v3274_v36 = vsel %vm818_vm1, %v3843_v3, %v3842_v57  ;;  %v957_v55 = vsel %vm938_vm5, %v3846_v43, %v3286_v54  ;;  %v3848_v57 = vld [vmem:[#allocation5_spill] sm:$0xff]  ;;  %v1069_v62 = vsel %vm1060_vm2, %v3851_v39, %v1068_v10  ;;  %v2032_v39 = vunpack.c.l.b16 %v3016_v22 }
 0x129   : > { %v3264_v28 = vpop.permute.xlu2 %860  ;;  %v3849_v3 = vrot.slane %v3848_v57, 1 }
 0x12b   : > { %v3326_v20 = vsel %vm576_vm0, %v3850_v21, %v3849_v3  ;;  %v3856_v3 = vld [vmem:[#allocation7_spill] sm:$0xff] }
 0x12c   : > { %v975_v21 = vrot.slane %v3856_v3, 3 }
 0x12e   : > { %556 = vrot.lane.b32.xlu1 %v467_v60, %s2138_s30  ;;  %908 = vrot.lane.b32.xlu0 %v3274_v36, %s2139_s6  ;;  %v1199_v60 = vsel %vm1171_vm7, %v1162_v5, %v3157_v40  ;;  %v733_v40 = vrot.slane %v2219_v11, 2 }
 0x12f   : > { %888 = vrot.lane.b32.xlu2 %v3045_v53, %s2136_s28  ;;  %v3847_v53 = vld [vmem:[#allocation24_spill] sm:$0xff] }
 0x130   : > { %v3288_v32 = vpop.permute.xlu1 %570  ;;  %v929_v13 = vpop.permute.xlu0 %928  ;;  %v899_v56 = vsel %vm818_vm1, %v3847_v53, %v898_v24 }
 0x131   : > { %v3293_v30 = vpop.permute.xlu2 %554 }
 0x136   : > { %630 = vrot.lane.b32.xlu1 %v3061_v19, %s2135_s27  ;;  %1030 = vrot.lane.b32.xlu0 %v957_v55, %s2141_s8  ;;  %v1236_v19 = vsel %vm1208_vm8, %v1199_v60, %v687_v51  ;;  %v1014_v51 = vsel %vm938_vm5, %v3852_v26, %v3314_v52  ;;  %v3347_v55 = vor.u32 %v733_v40, %v732_v0  ;;  %v3375_v40 = vld [vmem:[%s2197_s25 + $0x58] sm:$0xff] }
 0x137   : > { %934 = vrot.lane.b32.xlu2 %v899_v56, %s2139_s6  ;;  %v1273_v15 = vsel %vm1245_vm9, %v1236_v19, %v3174_v59  ;;  %v3855_v19 = vld [vmem:[#allocation9_spill] sm:$0xff]  ;;  %v1078_v26 = vrot.slane %v3375_v40, 3 }
 0x138   : > { %v3312_v35 = vpop.permute.xlu1 %644  ;;  %v1051_v25 = vpop.permute.xlu0 %1050  ;;  %v1310_v43 = vsel %vm1282_vm10, %v1273_v15, %v883_v8  ;;  %v974_v57 = vrot.slane %v3855_v19, 2  ;;  %v2036_v19 = vunpack.c.l.b16 %v3279_v6 }
 0x139   : > { %v3318_v4 = vpop.permute.xlu2 %628  ;;  %v1347_v34 = vsel %vm1319_vm11, %v1310_v43, %v929_v13  ;;  %v3853_v13 = vrot.slane %v3016_v22, 3  ;;  %v3865_v22 = vld [vmem:[#allocation21_spill] sm:$0xff] }
 0x13a   : > { %v1384_v56 = vsel %vm1356_vm12, %v1347_v34, %v1051_v25  ;;  %v3854_v25 = vld [vmem:[#allocation25_spill] sm:$0xff] }
 0x13b   : > { %v1095_v5 = vsel %vm1060_vm2, %v3853_v13, %v1094_v14  ;;  %v735_v60 = vsel %vm696_vm4, %v3854_v25, %v3347_v55  ;;  %v2103_v34 = vld [vmem:[%s2197_s25 + $0x10] sm:$0xff]  ;;  %v1079_v13 = vsel %vm1060_vm2, %v1076_v17, %v1078_v26  ;;  %v3860_v17 = vld [vmem:[#allocation22_spill] sm:$0xff] }
 0x13e   : > { %676 = vrot.lane.b32.xlu1 %v3326_v20, %s2134_s26  ;;  %1104 = vrot.lane.b32.xlu0 %v1069_v62, %s2137_s29  ;;  %v3372_v62 = vor.u32 %v975_v21, %v974_v57 }
 0x13f   : > { %1056 = vrot.lane.b32.xlu2 %v1014_v51, %s2141_s8  ;;  %v390_v51 = vpack.c.b16 %v2032_v39, %v2032_v39  ;;  %v655_v39 = vpack.c.b16 %v2036_v19, %v2036_v19 }
 0x140   : > { %v3350_v7 = vpop.permute.xlu1 %690  ;;  %v1125_v59 = vpop.permute.xlu0 %1124 }
 0x141   : > { %v1421_v8 = vsel %vm1393_vm13, %v1384_v56, %v1125_v59  ;;  %v3353_v37 = vpop.permute.xlu2 %674  ;;  %v1140_v56 = vsel %vm1134_vm6, %v2103_v34, %v3262_v29  ;;  %v977_v59 = vsel %vm938_vm5, %v3125_v45, %v3372_v62 }
 0x142   : > { %v1445_v58 = vsel %vm1430_vm14, %v1421_v8, 1065369472  ;;  %v3857_v8 = vld [vmem:[#allocation3_spill] sm:$0xff]  ;;  %v1177_v29 = vsel %vm1171_vm7, %v1140_v56, %v3188_v61  ;;  %v774_v56 = vshrl.u32 %v655_v39, 16 }
 0x143   : > { %1996 = vmatmul.msk.bf16.gmra.mxu2 %vm1450_vm15, %v1445_v58  ;;  %v1214_v9 = vsel %vm1208_vm8, %v1177_v29, %v3217_v18 }
 0x144   : > { %v1251_v21 = vsel %vm1245_vm9, %v1214_v9, %v3243_v12  ;;  %v612_v12 = vrot.slane %v390_v51, 1 }
 0x145   : > { %v1288_v42 = vsel %vm1282_vm10, %v1251_v21, %v3264_v28 }
 0x146   : > { %1130 = vrot.lane.b32.xlu1 %v1095_v5, %s2137_s29  ;;  %798 = vrot.lane.b32.xlu0 %v735_v60, %s2140_s7  ;;  %v536_v5 = vshll.u32 %v390_v51, 16  ;;  %v534_v60 = vor.u32 %v3860_v17, %v530_v47 }
 0x147   : > { %872 = vrot.lane.b32.xlu2 %v3111_v16, %s2136_s28  ;;  %v3858_v16 = vrot.slane %v3857_v8, 2 }
 0x148   : > { %v907_v0 = vpop.permute.xlu1 %906  ;;  %v813_v15 = vpop.permute.xlu0 %812  ;;  %v538_v61 = vrot.slane %v536_v5, 1  ;;  %v3863_v5 = vld [vmem:[#allocation16_spill] sm:$0xff] }
 0x149   : > { %v1129_v43 = vpop.permute.xlu2 %1128  ;;  %v3389_v58 = vsel %vm818_vm1, %v836_v38, %v3858_v16  ;;  %v3859_v38 = vld [vmem:[#allocation20_spill] sm:$0xff]  ;;  %v1325_v47 = vsel %vm1319_vm11, %v1288_v42, %v907_v0  ;;  %v3862_v0 = vld [vmem:[#allocation19_spill] sm:$0xff]  ;;  %v719_v29 = vsel %vm696_vm4, %v3212_v50, %v3863_v5  ;;  %v658_v50 = vrot.slane %v655_v39, 1  ;;  %v2104_v42 = vld [vmem:[%s2197_s25 + $0x38] sm:$0xff] }
 0x14a   : > { %v430_v45 = vor.u32 %v3859_v38, %v426_v2  ;;  %v539_v18 = vsel %vm391_vm3, %v534_v60, %v538_v61  ;;  %v1166_v51 = vsel %vm1134_vm6, %v3862_v0, %v3288_v32  ;;  %v776_v38 = vrot.slane %v774_v56, 1 }
 0x14b   : > { %v1203_v9 = vsel %vm1171_vm7, %v1166_v51, %v3312_v35 }
 0x14c   : > { %v435_v2 = vsel %vm391_vm3, %v430_v45, %v3861_v31 }
 0x14e   : > { %1040 = vrot.lane.b32.xlu1 %v977_v59, %s2141_s8  ;;  %918 = vrot.lane.b32.xlu0 %v3389_v58, %s2139_s6  ;;  %v777_v59 = vshll.u32 %v655_v39, 16 }
 0x14f   : > { %1114 = vrot.lane.b32.xlu2 %v1079_v13, %s2137_s29 }
 0x150   : > { %v1029_v25 = vpop.permute.xlu1 %1028  ;;  %v887_v57 = vpop.permute.xlu0 %886  ;;  %v779_v45 = vrot.slane %v777_v59, 2 }
 0x151   : > { %v3411_v3 = vpop.permute.xlu2 %568  ;;  %v1362_v48 = vsel %vm1356_vm12, %v1325_v47, %v1029_v25  ;;  %v1240_v25 = vsel %vm1208_vm8, %v1203_v9, %v3350_v7  ;;  %v1150_v47 = vsel %vm1134_vm6, %v2104_v42, %v3293_v30  ;;  %v3866_v30 = vrot.slane %v2219_v11, 1  ;;  %v3872_v42 = vld [vmem:[#allocation10_spill] sm:$0xff] }
 0x152   : > { %v1277_v32 = vsel %vm1245_vm9, %v1240_v25, %v813_v15  ;;  %v780_v61 = vor.u32 %v779_v45, %v776_v38  ;;  %v659_v15 = vsel %vm576_vm0, %v656_v44, %v658_v50  ;;  %v470_v44 = vor.u32 %v3865_v22, %v466_v46 }
 0x153   : > { %v1314_v17 = vsel %vm1282_vm10, %v1277_v32, %v887_v57 }
 0x154   : > { %v781_v57 = vsel %vm696_vm4, %v3240_v41, %v780_v61  ;;  %v854_v41 = vrot.slane %v655_v39, 2  ;;  %v2105_v61 = vld [vmem:[%s2197_s25 + $0x70] sm:$0xff] }
 0x156   : > { %622 = vrot.lane.b32.xlu1 %v3195_v63, %s2135_s27  ;;  %548 = vrot.lane.b32.xlu0 %v435_v2, %s2138_s30  ;;  %v613_v63 = vsel %vm576_vm0, %v2931_v27, %v612_v12  ;;  %v3864_v27 = vld [vmem:[#allocation15_spill] sm:$0xff]  ;;  %v855_v1 = vsel %vm818_vm1, %v3847_v53, %v854_v41 }
 0x157   : > { %574 = vrot.lane.b32.xlu2 %v539_v18, %s2138_s30  ;;  %v297_v18 = vld [vmem:[%s2197_s25 + $0xa0] sm:$0xf] }
 0x158   : > { %v1103_v34 = vpop.permute.xlu1 %1102  ;;  %v933_v16 = vpop.permute.xlu0 %932  ;;  %v895_v12 = vunpack.c.l.b16 %v297_v18 }
 0x159   : > { %v1399_v8 = vsel %vm1393_vm13, %v1362_v48, %v1103_v34  ;;  %v1113_v13 = vpop.permute.xlu2 %1112  ;;  %v1351_v35 = vsel %vm1319_vm11, %v1314_v17, %v933_v16  ;;  %v1187_v48 = vsel %vm1171_vm7, %v1150_v47, %v3318_v4  ;;  %v3867_v4 = vld [vmem:[#allocation17_spill] sm:$0xff]  ;;  %v739_v47 = vsel %vm696_vm4, %v3347_v55, %v3872_v42 }
 0x15a   : > { %v1434_v28 = vsel %vm1430_vm14, %v1399_v8, 1065369472  ;;  %v1224_v59 = vsel %vm1208_vm8, %v1187_v48, %v3353_v37  ;;  %v897_v8 = vpack.c.b16 %v895_v12, %v895_v12  ;;  %v3869_v17 = vld [vmem:[#allocation13_spill] sm:$0xff]  ;;  %v3873_v12 = vld [vmem:[#allocation11_spill] sm:$0xff]  ;;  %v3874_v48 = vld [vmem:[#allocation4_spill] sm:$0xff] }
 0x15b   : > { %1985 = vmatmul.msk.bf16.gmra.mxu0 %vm1450_vm15, %v1434_v28  ;;  %v981_v55 = vsel %vm938_vm5, %v3372_v62, %v3873_v12 }
 0x15c   : > { %v900_v16 = vrot.slane %v897_v8, 2  ;;  %v1016_v28 = vshrl.u32 %v897_v8, 16  ;;  %v1096_v33 = vrot.slane %v897_v8, 3 }
 0x15e   : > { %648 = vrot.lane.b32.xlu1 %v613_v63, %s2135_s27  ;;  %668 = vrot.lane.b32.xlu0 %v3864_v27, %s2134_s26  ;;  %v1019_v63 = vshll.u32 %v897_v8, 16  ;;  %v901_v9 = vsel %vm818_vm1, %v898_v24, %v900_v16  ;;  %v1018_v25 = vrot.slane %v1016_v28, 2  ;;  %v1097_v18 = vsel %vm1060_vm2, %v1094_v14, %v1096_v33  ;;  %v2106_v16 = vld [vmem:[%s2197_s25 + $0x18] sm:$0xff] }
 0x15f   : > { %790 = vrot.lane.b32.xlu2 %v719_v29, %s2140_s7  ;;  %v3868_v29 = vld [vmem:[#allocation18_spill] sm:$0xff] }
 0x160   : > { %v797_v60 = vpop.permute.xlu1 %796  ;;  %v1055_v19 = vpop.permute.xlu0 %1054  ;;  %v961_v38 = vsel %vm938_vm5, %v3286_v54, %v3868_v29  ;;  %v1021_v27 = vrot.slane %v1019_v63, 3 }
 0x161   : > { %v3449_v7 = vpop.permute.xlu2 %546  ;;  %v1388_v21 = vsel %vm1356_vm12, %v1351_v35, %v1055_v19  ;;  %v1261_v46 = vsel %vm1245_vm9, %v1224_v59, %v797_v60  ;;  %v3870_v60 = vrot.slane %v3869_v17, 3  ;;  %v1164_v35 = vsel %vm1134_vm6, %v2105_v61, %v3411_v3  ;;  %v2107_v61 = vld [vmem:[%s2197_s25 + $0x40] sm:$0xff] }
 0x162   : > { %v1425_v31 = vsel %vm1393_vm13, %v1388_v21, %v1129_v43  ;;  %v1022_v32 = vor.u32 %v1021_v27, %v1018_v25  ;;  %v1142_v28 = vsel %vm1134_vm6, %v2106_v16, %v3449_v7 }
 0x163   : > { %v1447_v2 = vsel %vm1430_vm14, %v1425_v31, 1065369472  ;;  %v1071_v24 = vsel %vm1060_vm2, %v1068_v10, %v3870_v60  ;;  %v3871_v31 = vld [vmem:[#allocation6_spill] sm:$0xff] }
 0x164   : > { %1998 = vmatmul.msk.bf16.vlgmr.msra.gmra.mxu3 %vm1450_vm15, %v1447_v2 }
 0x166   : > { %864 = vrot.lane.b32.xlu1 %v3274_v36, %s2136_s28  ;;  %694 = vrot.lane.b32.xlu0 %v659_v15, %s2134_s26  ;;  %v475_v36 = vsel %vm391_vm3, %v470_v44, %v3866_v30  ;;  %v3876_v30 = vld [vmem:[#allocation8_spill] sm:$0xff] }
 0x167   : > { %816 = vrot.lane.b32.xlu2 %v781_v57, %s2140_s7 }
 0x168   : > { %v917_v43 = vpop.permute.xlu1 %916  ;;  %v871_v34 = vpop.permute.xlu0 %870 }
 0x169   : > { %v931_v56 = vpop.permute.xlu2 %930  ;;  %v1298_v39 = vsel %vm1282_vm10, %v1261_v46, %v871_v34  ;;  %v3875_v34 = vrot.slane %v3874_v48, 3 }
 0x16a   : > { %v1335_v37 = vsel %vm1319_vm11, %v1298_v39, %v917_v43 }
 0x16e   : > { %558 = vrot.lane.b32.xlu1 %v475_v36, %s2138_s30  ;;  %910 = vrot.lane.b32.xlu0 %v3867_v4, %s2139_s6 }
 0x16f   : > { %890 = vrot.lane.b32.xlu2 %v855_v1, %s2136_s28 }
 0x170   : > { %v643_v11 = vpop.permute.xlu1 %642  ;;  %v1039_v0 = vpop.permute.xlu0 %1038 }
 0x171   : > { %v1053_v53 = vpop.permute.xlu2 %1052  ;;  %v1372_v51 = vsel %vm1356_vm12, %v1335_v37, %v1039_v0  ;;  %v1201_v19 = vsel %vm1171_vm7, %v1164_v35, %v643_v11 }
 0x172   : > { %v1409_v5 = vsel %vm1393_vm13, %v1372_v51, %v1113_v13 }
 0x173   : > { %v1439_v45 = vsel %vm1430_vm14, %v1409_v5, 1065369472 }
 0x174   : > { %1990 = vmatmul.msk.bf16.gmra.mxu1 %vm1450_vm15, %v1439_v45 }
 0x176   : > { %632 = vrot.lane.b32.xlu1 %v3326_v20, %s2135_s27  ;;  %1032 = vrot.lane.b32.xlu0 %v961_v38, %s2141_s8  ;;  %v1023_v20 = vsel %vm938_vm5, %v3314_v52, %v1022_v32 }
 0x177   : > { %936 = vrot.lane.b32.xlu2 %v901_v9, %s2139_s6 }
 0x178   : > { %v811_v13 = vpop.permute.xlu1 %810  ;;  %v689_v54 = vpop.permute.xlu0 %688 }
 0x179   : > { %v1127_v50 = vpop.permute.xlu2 %1126  ;;  %v1238_v21 = vsel %vm1208_vm8, %v1201_v19, %v689_v54 }
 0x17a   : > { %v1275_v15 = vsel %vm1245_vm9, %v1238_v21, %v811_v13 }
 0x17e   : > { %678 = vrot.lane.b32.xlu1 %v3871_v31, %s2134_s26  ;;  %1106 = vrot.lane.b32.xlu0 %v1071_v24, %s2137_s29 }
 0x17f   : > { %1058 = vrot.lane.b32.xlu2 %v1023_v20, %s2141_s8 }
 0x180   : > { %v621_v10 = vpop.permute.xlu1 %620  ;;  %v885_v2 = vpop.permute.xlu0 %884 }
 0x181   : > { %v815_v3 = vpop.permute.xlu2 %814  ;;  %v1312_v57 = vsel %vm1282_vm10, %v1275_v15, %v885_v2  ;;  %v1179_v37 = vsel %vm1171_vm7, %v1142_v28, %v621_v10  ;;  %v3574_v10 = vpop.f32.mrf.mxu2 }
 0x182   : > { %v1349_v52 = vsel %vm1319_vm11, %v1312_v57, %v931_v56  ;;  %v1081_v56 = vsel %vm1060_vm2, %v1078_v26, %v3875_v34 }
 0x183   : > { %v1386_v22 = vsel %vm1356_vm12, %v1349_v52, %v1053_v53 }
 0x184   : > { %v1423_v44 = vsel %vm1393_vm13, %v1386_v22, %v1127_v50 }
 0x185   : > { %v1446_v43 = vsel %vm1430_vm14, %v1423_v44, 1065369472 }
 0x186   : > { %1132 = vrot.lane.b32.xlu1 %v1097_v18, %s2137_s29  ;;  %800 = vrot.lane.b32.xlu0 %v739_v47, %s2140_s7 }
 0x187   : > { %1997 = vmatmul.msk.bf16.gmra.mxu2 %vm1450_vm15, %v1446_v43  ;;  %874 = vrot.lane.b32.xlu2 %v3389_v58, %s2136_s28  ;;  %v3584_v43 = vpop.f32.mrf.mxu1 }
 0x188   : > { %v667_v6 = vpop.permute.xlu1 %666  ;;  %v573_v14 = vpop.permute.xlu0 %572 }
 0x189   : > { %v889_v41 = vpop.permute.xlu2 %888  ;;  %v1168_v26 = vsel %vm1134_vm6, %v2839_v23, %v573_v14  ;;  %v1216_v53 = vsel %vm1208_vm8, %v1179_v37, %v667_v6  ;;  %v3582_v44 = vpop.f32.mrf.mxu2 }
 0x18e   : > { %920 = vrot.lane.b32.xlu0 %v3876_v30, %s2139_s6  ;;  %1042 = vrot.lane.b32.xlu1 %v981_v55, %s2141_s8 }
 0x18f   : > { %1116 = vrot.lane.b32.xlu2 %v1081_v56, %s2137_s29  ;;  %v3588_v55 = vpop.f32.mrf.mxu1 }
 0x190   : > { %v789_v58 = vpop.permute.xlu1 %788  ;;  %v647_v36 = vpop.permute.xlu0 %646 }
 0x191   : > { %v935_v59 = vpop.permute.xlu2 %934  ;;  %v1205_v63 = vsel %vm1171_vm7, %v1168_v26, %v647_v36  ;;  %v1253_v51 = vsel %vm1245_vm9, %v1216_v53, %v789_v58  ;;  %v3586_v12 = vpop.f32.mrf.mxu2 }
 0x198   : > { %v863_v1 = vpop.permute.xlu1 %862  ;;  %v693_v8 = vpop.permute.xlu0 %692 }
 0x199   : > { %v1057_v62 = vpop.permute.xlu2 %1056  ;;  %v1242_v0 = vsel %vm1208_vm8, %v1205_v63, %v693_v8  ;;  %v1290_v5 = vsel %vm1282_vm10, %v1253_v51, %v863_v1  ;;  %v3590_v30 = vpop.f32.mrf.mxu2 }
 0x19a   : > { %v1279_v29 = vsel %vm1245_vm9, %v1242_v0, %v815_v3 }
 0x19b   : > { %v1316_v9 = vsel %vm1282_vm10, %v1279_v29, %v889_v41 }
 0x19c   : > { %v1353_v32 = vsel %vm1319_vm11, %v1316_v9, %v935_v59 }
 0x19d   : > { %v1390_v54 = vsel %vm1356_vm12, %v1353_v32, %v1057_v62  ;;  %v2108_v62 = vld [vmem:[%s2197_s25 + $0x20] sm:$0xff] }
 0x1a0   : > { %v557_v46 = vpop.permute.xlu1 %556  ;;  %v909_v39 = vpop.permute.xlu0 %908 }
 0x1a1   : > { %v873_v40 = vpop.permute.xlu2 %872  ;;  %v1327_v23 = vsel %vm1319_vm11, %v1290_v5, %v909_v39  ;;  %v1152_v35 = vsel %vm1134_vm6, %v2107_v61, %v557_v46  ;;  %v3592_v58 = vpop.f32.mrf.mxu1 }
 0x1a2   : > { %v3594_v1 = vpop.f32.mrf.mxu2 }
 0x1a8   : > { %v631_v4 = vpop.permute.xlu1 %630  ;;  %v1031_v11 = vpop.permute.xlu0 %1030 }
 0x1a9   : > { %v1364_v7 = vsel %vm1356_vm12, %v1327_v23, %v1031_v11  ;;  %v1115_v27 = vpop.permute.xlu2 %1114  ;;  %v1189_v20 = vsel %vm1171_vm7, %v1152_v35, %v631_v4  ;;  %v1593_v11 = vpop.f32.mrf.mxu1 }
 0x1aa   : > { %v3605_v53 = vpop.f32.mrf.mxu2 }
 0x1b0   : > { %v677_v38 = vpop.permute.xlu1 %676  ;;  %v1105_v45 = vpop.permute.xlu0 %1104 }
 0x1b1   : > { %v1401_v25 = vsel %vm1393_vm13, %v1364_v7, %v1105_v45  ;;  %v1226_v19 = vsel %vm1208_vm8, %v1189_v20, %v677_v38  ;;  %v575_v21 = vpop.permute.xlu2 %574 }
 0x1b2   : > { %v1435_v13 = vsel %vm1430_vm14, %v1401_v25, 1065369472  ;;  %v1170_v26 = vsel %vm1134_vm6, %v2913_v49, %v575_v21 }
 0x1b3   : > { %1986 = vmatmul.msk.bf16.gmra.mxu0 %vm1450_vm15, %v1435_v13 }
 0x1b8   : > { %v1131_v50 = vpop.permute.xlu1 %1130  ;;  %v799_v60 = vpop.permute.xlu0 %798 }
 0x1b9   : > { %v1427_v17 = vsel %vm1393_vm13, %v1390_v54, %v1131_v50  ;;  %v1263_v31 = vsel %vm1245_vm9, %v1226_v19, %v799_v60  ;;  %v791_v42 = vpop.permute.xlu2 %790 }
 0x1ba   : > { %v1448_v24 = vsel %vm1430_vm14, %v1427_v17, 1065369472  ;;  %v1300_v15 = vsel %vm1282_vm10, %v1263_v31, %v873_v40  ;;  %v2109_v31 = vld [vmem:[%s2197_s25 + $0x48] sm:$0xff] }
 0x1bb   : > { %1999 = vmatmul.msk.bf16.gmra.mxu3 %vm1450_vm15, %v1448_v24 }
 0x1c0   : > { %v1041_v33 = vpop.permute.xlu1 %1040  ;;  %v919_v2 = vpop.permute.xlu0 %918 }
 0x1c1   : > { %v1337_v3 = vsel %vm1319_vm11, %v1300_v15, %v919_v2  ;;  %v817_v14 = vpop.permute.xlu2 %816 }
 0x1c2   : > { %v1374_v57 = vsel %vm1356_vm12, %v1337_v3, %v1041_v33 }
 0x1c3   : > { %v1411_v52 = vsel %vm1393_vm13, %v1374_v57, %v1115_v27 }
 0x1c4   : > { %v1440_v18 = vsel %vm1430_vm14, %v1411_v52, 1065369472 }
 0x1c5   : > { %1991 = vmatmul.msk.bf16.gmra.mxu1 %vm1450_vm15, %v1440_v18  ;;  %v1664_v18 = vmax.f32 %v1593_v11, 0.0  ;;  %v1674_v11 = vmax.f32 %v3590_v30, 0.0 }
 0x1c6   : > { %v1626_v60 = vpop.f32.mrf.mxu2 }
 0x1c8   : > { %v623_v47 = vpop.permute.xlu1 %622  ;;  %v549_v22 = vpop.permute.xlu0 %548 }
 0x1c9   : > { %v891_v56 = vpop.permute.xlu2 %890  ;;  %v1144_v46 = vsel %vm1134_vm6, %v2108_v62, %v549_v22 }
 0x1ca   : > { %v1181_v16 = vsel %vm1171_vm7, %v1144_v46, %v623_v47  ;;  %v1663_v47 = vmax.f32 %v3592_v58, 0.0 }
 0x1d0   : > { %v649_v6 = vpop.permute.xlu1 %648  ;;  %v669_v41 = vpop.permute.xlu0 %668 }
 0x1d1   : > { %v937_v8 = vpop.permute.xlu2 %936  ;;  %v1207_v28 = vsel %vm1171_vm7, %v1170_v26, %v649_v6  ;;  %v1218_v63 = vsel %vm1208_vm8, %v1181_v16, %v669_v41  ;;  %v1628_v41 = vpop.f32.mrf.mxu2  ;;  %v1673_v26 = vmax.f32 %v3586_v12, 0.0  ;;  %v1672_v16 = vmax.f32 %v3582_v44, 0.0 }
 0x1d2   : > { %v1255_v0 = vsel %vm1245_vm9, %v1218_v63, %v791_v42  ;;  %v1561_v63 = vpop.f32.mrf.mxu0 }
 0x1d8   : > { %v865_v48 = vpop.permute.xlu1 %864  ;;  %v695_v34 = vpop.permute.xlu0 %694 }
 0x1d9   : > { %v1244_v37 = vsel %vm1208_vm8, %v1207_v28, %v695_v34  ;;  %v1292_v51 = vsel %vm1282_vm10, %v1255_v0, %v865_v48  ;;  %v1059_v29 = vpop.permute.xlu2 %1058  ;;  %v1662_v34 = vmax.f32 %v3588_v55, 0.0  ;;  %v1677_v55 = vmax.f32 %v1626_v60, 0.0 }
 0x1da   : > { %v1281_v5 = vsel %vm1245_vm9, %v1244_v37, %v817_v14  ;;  %v1671_v28 = vmax.f32 %v3574_v10, 0.0  ;;  %v1563_v37 = vpop.f32.mrf.mxu0 }
 0x1db   : > { %v1318_v25 = vsel %vm1282_vm10, %v1281_v5, %v891_v56 }
 0x1dc   : > { %v1355_v50 = vsel %vm1319_vm11, %v1318_v25, %v937_v8 }
 0x1dd   : > { %v1392_v24 = vsel %vm1356_vm12, %v1355_v50, %v1059_v29 }
 0x1e0   : > { %v559_v36 = vpop.permute.xlu1 %558  ;;  %v911_v59 = vpop.permute.xlu0 %910 }
 0x1e1   : > { %v1329_v23 = vsel %vm1319_vm11, %v1292_v51, %v911_v59  ;;  %v875_v17 = vpop.permute.xlu2 %874  ;;  %v1154_v33 = vsel %vm1134_vm6, %v2109_v31, %v559_v36  ;;  %v1661_v59 = vmax.f32 %v3584_v43, 0.0  ;;  %v1675_v43 = vmax.f32 %v3594_v1, 0.0 }
 0x1e2   : > { %v1566_v0 = vpop.f32.mrf.mxu0  ;;  %v1651_v31 = vmax.f32 %v1561_v63, 0.0 }
 0x1e3   : > { %v1653_v60 = vmax.f32 %v1566_v0, 0.0 }
 0x1e7   : > { %v1636_v39 = vpop.f32.mrf.mxu3 }
 0x1e8   : > { %v633_v4 = vpop.permute.xlu1 %632  ;;  %v1033_v40 = vpop.permute.xlu0 %1032  ;;  %v1681_v32 = vmax.f32 %v1636_v39, 0.0 }
 0x1e9   : > { %v1366_v7 = vsel %vm1356_vm12, %v1329_v23, %v1033_v40  ;;  %v1191_v2 = vsel %vm1171_vm7, %v1154_v33, %v633_v4  ;;  %v1117_v14 = vpop.permute.xlu2 %1116  ;;  %v1678_v4 = vmax.f32 %v1628_v41, 0.0  ;;  %v1676_v40 = vmax.f32 %v3605_v53, 0.0  ;;  %v1773_v41 = vld [vmem:[%s3711_s3 + $0x50] sm:$0xff] }
 0x1ea   : > { %v1568_v53 = vpop.f32.mrf.mxu0 }
 0x1ef   : > { %v1638_v49 = vpop.f32.mrf.mxu3 }
 0x1f0   : > { %v679_v38 = vpop.permute.xlu1 %678  ;;  %v1682_v45 = vmax.f32 %v1638_v49, 0.0  ;;  %v1107_v9 = vpop.permute.xlu0 %1106 }
 0x1f1   : > { %v1403_v27 = vsel %vm1393_vm13, %v1366_v7, %v1107_v9  ;;  %v1596_v13 = vpop.f32.mrf.mxu1  ;;  %v1228_v3 = vsel %vm1208_vm8, %v1191_v2, %v679_v38 }
 0x1f2   : > { %1717 = vmatpush.msrb.mxu2 %v1682_v45  ;;  %v1436_v54 = vsel %vm1430_vm14, %v1403_v27, 1065369472  ;;  %v1665_v57 = vmax.f32 %v1596_v13, 0.0  ;;  %v1571_v51 = vpop.f32.mrf.mxu0 }
 0x1f3   : > { %1987 = vmatmul.msk.bf16.gmra.mxu0 %vm1450_vm15, %v1436_v54  ;;  %v1654_v54 = vmax.f32 %v1568_v53, 0.0 }
 0x1f4   : > { %1718 = vmatpush.msrb.mxu2 %v1681_v32  ;;  %v1655_v32 = vmax.f32 %v1571_v51, 0.0 }
 0x1f8   : > { %v1133_v61 = vpop.permute.xlu1 %1132  ;;  %v801_v20 = vpop.permute.xlu0 %800 }
 0x1f9   : > { %v1429_v35 = vsel %vm1393_vm13, %v1392_v24, %v1133_v61  ;;  %v1598_v19 = vpop.f32.mrf.mxu1  ;;  %v1265_v52 = vsel %vm1245_vm9, %v1228_v3, %v801_v20  ;;  %v1652_v61 = vmax.f32 %v1563_v37, 0.0  ;;  %v1779_v37 = vld [vmem:[%s3712_s4] sm:$0x1] }
 0x1fa   : > { %v1449_v21 = vsel %vm1430_vm14, %v1429_v35, 1065369472  ;;  %v1666_v15 = vmax.f32 %v1598_v19, 0.0  ;;  %v1302_v22 = vsel %vm1282_vm10, %v1265_v52, %v875_v17  ;;  %v1573_v1 = vpop.f32.mrf.mxu0  ;;  %v1688_v35 = vld [vmem:[%s3710_s2] sm:$0x7] }
 0x1fb   : > { %2000 = vmatmul.msk.bf16.gmra.mxu3 %vm1450_vm15, %v1449_v21  ;;  %v1656_v27 = vmax.f32 %v1573_v1, 0.0  ;;  %v1690_v21 = vperm.slane %v1688_v35, 0 }
 0x1fc   : > { %1697 = vmatpush.msrb.mxu1 %v1666_v15  ;;  %v1692_v15 = vperm.slane %v1688_v35, 2 }
 0x1fe   : > { %1698 = vmatpush.msrb.mxu1 %v1665_v57  ;;  %v1778_v57 = vld [vmem:[%s3711_s3 + $0x78] sm:$0xff] }
 0x200   : > { %v1043_v42 = vpop.permute.xlu1 %1042  ;;  %1699 = vmatpush.msrb.mxu1 %v1664_v18  ;;  %v921_v6 = vpop.permute.xlu0 %920  ;;  %v1777_v18 = vld [vmem:[%s3711_s3 + $0x70] sm:$0xff] }
 0x201   : > { %v1339_v48 = vsel %vm1319_vm11, %v1302_v22, %v921_v6  ;;  %v1776_v22 = vld [vmem:[%s3711_s3 + $0x68] sm:$0xff]  ;;  %v1775_v6 = vld [vmem:[%s3711_s3 + $0x60] sm:$0xff] }
 0x202   : > { %v1376_v56 = vsel %vm1356_vm12, %v1339_v48, %v1043_v42  ;;  %1700 = vmatpush.msrb.mxu1 %v1663_v47  ;;  %v1691_v42 = vperm.slane %v1688_v35, 1  ;;  %v1772_v48 = vld [vmem:[%s3711_s3 + $0x48] sm:$0xff] }
 0x203   : > { %v1413_v36 = vsel %vm1393_vm13, %v1376_v56, %v1117_v14  ;;  %v1774_v14 = vld [vmem:[%s3711_s3 + $0x58] sm:$0xff]  ;;  %v2142_v56 = vmov 0.0  }
 0x204   : > { %1701 = vmatpush.msrb.mxu1 %v1662_v34  ;;  %v1441_v58 = vsel %vm1430_vm14, %v1413_v36, 1065369472  ;;  %v1771_v34 = vld [vmem:[%s3711_s3 + $0x40] sm:$0xff]  ;;  %255 = vst [vmem:[#allocation2] sm:$0x1] %v2142_v56  ;;  %v1770_v36 = vld [vmem:[%s3711_s3 + $0x38] sm:$0xff] }
 0x205   : > { %1992 = vmatmul.msk.bf16.gmra.mxu1 %vm1450_vm15, %v1441_v58  ;;  %v1768_v58 = vld [vmem:[%s3711_s3 + $0x28] sm:$0xff] }
 0x206   : > { %1702 = vmatpush.msrb.mxu1 %v1661_v59  ;;  %v1769_v59 = vld [vmem:[%s3711_s3 + $0x30] sm:$0xff] }
 0x20a   : > { %v1631_v8 = vpop.f32.mrf.mxu2 }
 0x20b   : > { %v1679_v39 = vmax.f32 %v1631_v8, 0.0  ;;  %v1767_v8 = vld [vmem:[%s3711_s3 + $0x20] sm:$0xff] }
 0x212   : > { %v1633_v62 = vpop.f32.mrf.mxu2 }
 0x213   : > { %v1680_v46 = vmax.f32 %v1633_v62, 0.0  ;;  %v1766_v62 = vld [vmem:[%s3711_s3 + $0x18] sm:$0xff] }
 0x215   : > { %1719 = vmatpush.msrb.mxu2 %v1680_v46  ;;  %v1765_v46 = vld [vmem:[%s3711_s3 + $0x10] sm:$0xff] }
 0x217   : > { %1720 = vmatpush.msrb.mxu2 %v1679_v39  ;;  %v1764_v39 = vld [vmem:[%s3711_s3 + $0x8] sm:$0xff] }
 0x219   : > { %1721 = vmatpush.msrb.mxu2 %v1678_v4  ;;  %v1763_v4 = vld [vmem:[%s3711_s3] sm:$0xff] }
 0x21b   : > { %1722 = vmatpush.msrb.mxu2 %v1677_v55 }
 0x21d   : > { %1723 = vmatpush.msrb.mxu2 %v1676_v40 }
 0x21f   : > { %1724 = vmatpush.msrb.mxu2 %v1675_v43 }
 0x221   : > { %1725 = vmatpush.msrb.mxu2 %v1674_v11 }
 0x223   : > { %1726 = vmatpush.msrb.mxu2 %v1673_v26  ;;  %v1687_v26 = vld [vmem:[#allocation2] sm:$0x1] }
 0x225   : > { %1727 = vmatpush.msrb.mxu2 %v1672_v16 }
 0x227   : > { %1728 = vmatpush.msrb.mxu2 %v1671_v28 }
 0x230   : > { %v1576_v5 = vpop.f32.mrf.mxu0 }
 0x231   : > { %v1657_v25 = vmax.f32 %v1576_v5, 0.0 }
 0x238   : > { %v1578_v29 = vpop.f32.mrf.mxu0 }
 0x239   : > { %v1658_v10 = vmax.f32 %v1578_v29, 0.0 }
 0x23e   : > { %v1641_v30 = vpop.f32.mrf.mxu3 }
 0x23f   : > { %v1683_v2 = vmax.f32 %v1641_v30, 0.0 }
 0x242   : > { %v1601_v23 = vpop.f32.mrf.mxu1 }
 0x243   : > { %v1667_v47 = vmax.f32 %v1601_v23, 0.0 }
 0x246   : > { %v1643_v12 = vpop.f32.mrf.mxu3 }
 0x247   : > { %v1684_v20 = vmax.f32 %v1643_v12, 0.0 }
 0x24a   : > { %v1603_v44 = vpop.f32.mrf.mxu1 }
 0x24b   : > { %v1668_v52 = vmax.f32 %v1603_v44, 0.0 }
 0x270   : > { %v1581_v49 = vpop.f32.mrf.mxu0 }
 0x271   : > { %v1659_v45 = vmax.f32 %v1581_v49, 0.0 }
 0x278   : > { %v1583_v38 = vpop.f32.mrf.mxu0 }
 0x279   : > { %v1660_v7 = vmax.f32 %v1583_v38, 0.0 }
 0x27b   : > { %1703 = vmatpush.msrb.mxu1 %v1660_v7 }
 0x27d   : > { %1704 = vmatpush.msrb.mxu1 %v1659_v45 }
 0x27e   : > { %v1646_v9 = vpop.f32.mrf.mxu3 }
 0x27f   : > { %1705 = vmatpush.msrb.mxu1 %v1658_v10  ;;  %v1685_v24 = vmax.f32 %v1646_v9, 0.0 }
 0x281   : > { %1706 = vmatpush.msrb.mxu1 %v1657_v25 }
 0x282   : > { %v1606_v13 = vpop.f32.mrf.mxu1 }
 0x283   : > { %1707 = vmatpush.msrb.mxu1 %v1656_v27  ;;  %v1669_v3 = vmax.f32 %v1606_v13, 0.0 }
 0x285   : > { %1708 = vmatpush.msrb.mxu1 %v1655_v32 }
 0x286   : > { %v1648_v50 = vpop.f32.mrf.mxu3 }
 0x287   : > { %v1686_v17 = vmax.f32 %v1648_v50, 0.0  ;;  %1709 = vmatpush.msrb.mxu1 %v1654_v54 }
 0x289   : > { %1749 = vmatpush.msrb.mxu3 %v1686_v17  ;;  %1710 = vmatpush.msrb.mxu1 %v1653_v60 }
 0x28a   : > { %v1608_v19 = vpop.f32.mrf.mxu1 }
 0x28b   : > { %1750 = vmatpush.msrb.mxu3 %v1685_v24  ;;  %v1670_v33 = vmax.f32 %v1608_v19, 0.0  ;;  %1711 = vmatpush.msrb.mxu1 %v1652_v61 }
 0x28d   : > { %1751 = vmatpush.msrb.mxu3 %v1684_v20  ;;  %1712 = vmatpush.msrb.mxu1 %v1651_v31 }
 0x28e   : > { %1729 = vmatpush.msrb.mxu2 %v1670_v33  ;;  %1713 = vmatmul.f32.vlgmr.msrb.gmra.mxu1 %v1690_v21 }
 0x28f   : > { %1752 = vmatpush.msrb.mxu3 %v1683_v2 }
 0x290   : > { %1730 = vmatpush.msrb.mxu2 %v1669_v3  ;;  %2001 = vmatmul.msk.f32.vlgmr.msrb.gmra.mxu3 %vm1393_vm13, %v1692_v15 }
 0x291   : > { %1780 = vmatpush.msra.mxu3 %v1778_v57 }
 0x292   : > { %1731 = vmatpush.msrb.mxu2 %v1668_v52 }
 0x293   : > { %1781 = vmatpush.msra.mxu3 %v1777_v18 }
 0x294   : > { %1732 = vmatpush.msrb.mxu2 %v1667_v47 }
 0x295   : > { %1733 = vmatmul.f32.vlgmr.msrb.gmra.mxu2 %v1691_v42  ;;  %1782 = vmatpush.msra.mxu3 %v1776_v22 }
 0x297   : > { %1783 = vmatpush.msra.mxu3 %v1775_v6 }
 0x299   : > { %1784 = vmatpush.msra.mxu3 %v1774_v14 }
 0x29b   : > { %1785 = vmatpush.msra.mxu3 %v1773_v41 }
 0x29d   : > { %1786 = vmatpush.msra.mxu3 %v1772_v48 }
 0x29f   : > { %1787 = vmatpush.msra.mxu3 %v1771_v34 }
 0x2a1   : > { %1788 = vmatpush.msra.mxu3 %v1770_v36 }
 0x2a3   : > { %1789 = vmatpush.msra.mxu3 %v1769_v59 }
 0x2a5   : > { %1790 = vmatpush.msra.mxu3 %v1768_v58 }
 0x2a7   : > { %1791 = vmatpush.msra.mxu3 %v1767_v8 }
 0x2a9   : > { %1792 = vmatpush.msra.mxu3 %v1766_v62 }
 0x2ab   : > { %1793 = vmatpush.msra.mxu3 %v1765_v46 }
 0x2ad   : > { %1794 = vmatpush.msra.mxu3 %v1764_v39 }
 0x2af   : > { %1795 = vmatpush.msra.mxu3 %v1763_v4 }
 0x30b   : > { %v1714_v55 = vpop.f32.mrf.mxu1 }
 0x313   : > { %v1754_v43 = vpop.f32.mrf.mxu3 }
 0x318   : > { %v1734_v40 = vpop.f32.mrf.mxu2 }
 0x319   : > { %v1735_v11 = vadd.f32 %v1734_v40, %v1714_v55 }
 0x31b   : > { %v1755_v16 = vadd.f32 %v1754_v43, %v1735_v11 }
 0x31d   : > { %v1757_v28 = vadd.f32 %v1755_v16, %v1687_v26 }
 0x31f   : > { %1758 = vst [vmem:[#allocation2] sm:$0x1] %v1757_v28 }
 0x326   : > { %v1762_v63 = vld [vmem:[#allocation2] sm:$0x1] }
 0x327   : > { %1796 = vmatmul.f32.vlgmr.msra.gmra.mxu3 %v1762_v63 }
 0x3aa   : > { %v1797_v0 = vpop.f32.mrf.mxu3 }
 0x3ab   : > { %v1798_v53 = vadd.f32 %v1797_v0, %v1779_v37 }
 0x3ad   : > { %v1800_v51 = vperm.slane %v1798_v53, 0 }
 0x3af   : > { %1801 = vst [vmem:[%s248_s10] sm:$0xff] %v1800_v51 }
 0x3b0 PF: > { %s15_s20 = sadd.s32 1, %s2132_s20   ;;  %s3877_s18 = smov %s2128_s19 }
 0x3b1   : > { %p12_p5 = scmp.ge.s32.totalorder %s15_s20, 4   ;;  %s3878_s19 = smov %s3880_s21 }
 0x3b3   :  { %14 = sbr.rel (!%p12_p5) target bundleno = 2 (0x2), region = 78 }

</bundles_post_ra>
